<compile_context>
chip_gen: v6e
topology: v6e:2x2x1
jax: 0.10.0
libtpu: 0.0.40
codegen_flags: <defaults>
</compile_context>

<pallas_src>
import functools

import jax
import jax.numpy as jnp
from jax.experimental import pallas as pl
from jax.experimental.pallas import tpu as pltpu


def _f32(x):
    x = jnp.asarray(x)
    return x if x.dtype == jnp.float32 else x.astype(jnp.float32)


def _pick_block_b(B):
    """Batch tile: multiple of 8 (sublane alignment of the (Bt, N) side blocks),
    capped at 32 sets per step, and >= 2 grid steps whenever the batch allows
    (v7x megacore)."""
    if B <= 8:
        return 8
    tiles = max(2, pl.cdiv(B, 32))
    bt = pl.cdiv(B, tiles)
    return min(32, pl.cdiv(bt, 8) * 8)


def _temporal_loss_kernel(emb_ref, t_ref, unc_ref, *rest, n_emotional,
                          emotional_weight):
    """Bt point-sets per grid step.

    emb_ref  : (Bt, N, D)  embeddings
    t_ref    : (Bt, N)     temporal order
    unc_ref  : (Bt, N)     per-point uncertainty
    [epred_ref, elab_ref] : (Bt, N, E) each, only when n_emotional > 0
    out_ref  : (1, Bt)     per-set total loss (lane-dense row)
    """
    if n_emotional > 0:
        epred_ref, elab_ref, out_ref = rest
    else:
        (out_ref,) = rest

    emb = emb_ref[...].astype(jnp.float32)                    # (Bt, N, D)
    t = t_ref[...].astype(jnp.float32)                        # (Bt, N)
    unc = unc_ref[...].astype(jnp.float32)                    # (Bt, N)

    bt, n, _ = emb.shape

    # Batched Gram trick: one batched dot_general covers all Bt sets.
    gram = jax.lax.dot_general(
        emb, emb,
        dimension_numbers=(((2,), (2,)), ((0,), (0,))),
        preferred_element_type=jnp.float32)                   # (Bt, N, N)
    s = jnp.sum(emb * emb, axis=-1)                           # (Bt, N)
    sq = s[:, :, None] + s[:, None, :] - 2.0 * gram
    dists = jnp.sqrt(jnp.maximum(sq, 0.0))                    # (Bt, N, N)

    true_dists = jnp.abs(t[:, :, None] - t[:, None, :])       # (Bt, N, N)

    d = dists - true_dists
    temporal_l = jnp.sum(jnp.sum(d * d, axis=-1), axis=-1) * (1.0 / float(n * n))

    target_unc = jnp.sum(true_dists, axis=-1) * (1.0 / float(n))   # (Bt, N)
    du = unc - target_unc
    uncertainty_l = jnp.sum(du * du, axis=-1) * (1.0 / float(n))   # (Bt,)

    total = temporal_l + 0.5 * uncertainty_l                  # (Bt,)

    if n_emotional > 0:  # static (Python-level) branch
        epred = epred_ref[...].astype(jnp.float32)            # (Bt, N, E)
        elab = elab_ref[...].astype(jnp.float32)
        de = epred - elab
        emo_l = (jnp.sum(jnp.sum(de * de, axis=-1), axis=-1)
                 * (1.0 / float(n * n_emotional)))
        total = total + emotional_weight * emo_l

    out_ref[...] = total[None, :]                             # (1, Bt)


def temporal_loss_batched(embeddings, temporal_order, uncertainties,
                          emotional_preds=None, emotional_labels=None):
    """Batched loss: one pallas_call evaluates B independent point-sets.

    embeddings       : (B, N, D)
    temporal_order   : (B, N)
    uncertainties    : (B, N, 1) or (B, N)
    emotional_preds  : (B, N, E) or None
    emotional_labels : (B, N, E) or None
    Returns (B,) f32 losses.
    """
    embeddings = _f32(embeddings)
    B, N, D = embeddings.shape
    t = _f32(temporal_order).reshape(B, N)
    unc = _f32(uncertainties).reshape(B, N)

    has_emotional = emotional_labels is not None
    if has_emotional:
        epred = _f32(emotional_preds)
        E = epred.shape[-1]
        epred = epred.reshape(B, N, E)
        elab = _f32(emotional_labels).reshape(B, N, E)
        emotional_weight = 0.3
    else:
        E = 0
        emotional_weight = 0.0

    Bt = _pick_block_b(B)
    num_tiles = pl.cdiv(B, Bt)
    Bp = num_tiles * Bt
    if Bp != B:
        pad = Bp - B
        # Zero-padded sets produce finite garbage losses that are discarded below;
        # each set's loss is independent so padding cannot corrupt real results.
        embeddings = jnp.pad(embeddings, ((0, pad), (0, 0), (0, 0)))
        t = jnp.pad(t, ((0, pad), (0, 0)))
        unc = jnp.pad(unc, ((0, pad), (0, 0)))
        if has_emotional:
            epred = jnp.pad(epred, ((0, pad), (0, 0), (0, 0)))
            elab = jnp.pad(elab, ((0, pad), (0, 0), (0, 0)))

    in_specs = [
        pl.BlockSpec((Bt, N, D), lambda b: (b, 0, 0)),
        pl.BlockSpec((Bt, N), lambda b: (b, 0)),
        pl.BlockSpec((Bt, N), lambda b: (b, 0)),
    ]
    operands = [embeddings, t, unc]
    if has_emotional:
        in_specs.append(pl.BlockSpec((Bt, N, E), lambda b: (b, 0, 0)))
        in_specs.append(pl.BlockSpec((Bt, N, E), lambda b: (b, 0, 0)))
        operands.append(epred)
        operands.append(elab)

    kernel = functools.partial(_temporal_loss_kernel, n_emotional=E,
                               emotional_weight=emotional_weight)

    out = pl.pallas_call(
        kernel,
        out_shape=jax.ShapeDtypeStruct((num_tiles, 1, Bt), jnp.float32),
        grid=(num_tiles,),
        in_specs=in_specs,
        out_specs=pl.BlockSpec((None, 1, Bt), lambda b: (b, 0, 0)),
        compiler_params=pltpu.CompilerParams(
            dimension_semantics=("parallel",)),
    )(*operands)
    return out.reshape(Bp)[:B]


def temporal_loss(embeddings, temporal_order, uncertainties,
                  emotional_preds=None, emotional_labels=None):
    """Single point-set wrapper mirroring TemporalLoss.forward (points pre-stacked)."""
    N, _ = embeddings.shape
    ep = None if emotional_preds is None else emotional_preds[None]
    el = None if emotional_labels is None else emotional_labels[None]
    out = temporal_loss_batched(embeddings[None], temporal_order[None],
                                jnp.asarray(uncertainties).reshape(1, N, 1),
                                ep, el)
    return out[0]


def _reference_single(embeddings, temporal_order, uncertainties,
                      emotional_preds=None, emotional_labels=None):
    """Plain-JAX reference mirroring the PyTorch forward."""
    e = embeddings.astype(jnp.float32)
    sq_norm = jnp.sum(e * e, axis=-1, keepdims=True)
    sq = sq_norm + sq_norm.T - 2.0 * (e @ e.T)
    dists = jnp.sqrt(jnp.maximum(sq, 0.0))
    t = temporal_order.astype(jnp.float32)
    true_dists = jnp.abs(t[:, None] - t[None, :])
    temporal_l = jnp.mean((dists - true_dists) ** 2)
    target_unc = jnp.mean(true_dists, axis=1, keepdims=True)
    uncertainty_l = jnp.mean((uncertainties - target_unc) ** 2)
    total = temporal_l + 0.5 * uncertainty_l
    if emotional_labels is not None:
        total = total + 0.3 * jnp.mean((emotional_preds - emotional_labels) ** 2)
    return total


if __name__ == "__main__":
    # Small shapes implied by the forward: N points, D-dim embeddings, scalar
    # uncertainty per point, E-dim emotional valence; B point-sets batched.
    # B=20 is deliberately not a multiple of the batch tile so the padding path
    # is exercised, and yields 2 "parallel" grid steps (v7x megacore).
    B, N, D, E = 20, 8, 32, 4
    key = jax.random.PRNGKey(0)
    k_emb, k_t, k_unc, k_pred, k_lab = jax.random.split(key, 5)

    embeddings = jax.random.normal(k_emb, (B, N, D), dtype=jnp.float32)
    temporal_order = jax.random.uniform(k_t, (B, N), dtype=jnp.float32) * N
    uncertainties = jax.random.uniform(k_unc, (B, N, 1), dtype=jnp.float32)
    emotional_preds = jax.random.normal(k_pred, (B, N, E), dtype=jnp.float32)
    emotional_labels = jax.random.normal(k_lab, (B, N, E), dtype=jnp.float32)

    # Batched path: one pallas_call, Bt point-sets per grid step.
    out_b = jax.block_until_ready(
        temporal_loss_batched(embeddings, temporal_order, uncertainties,
                              emotional_preds, emotional_labels))
    ref_b = jax.vmap(_reference_single)(embeddings, temporal_order,
                                        uncertainties, emotional_preds,
                                        emotional_labels)
    assert out_b.shape == (B,)
    assert jnp.allclose(out_b, ref_b, rtol=1e-4, atol=1e-4), (out_b, ref_b)

    # Single point-set path mirroring TemporalLoss.forward.
    out_1 = jax.block_until_ready(
        temporal_loss(embeddings[0], temporal_order[0], uncertainties[0],
                      emotional_preds[0], emotional_labels[0]))
    ref_1 = _reference_single(embeddings[0], temporal_order[0],
                              uncertainties[0], emotional_preds[0],
                              emotional_labels[0])
    assert jnp.allclose(out_1, ref_1, rtol=1e-4, atol=1e-4), (out_1, ref_1)

    # emotional_labels=None branch (static weight 0, no emotional specs/DMA).
    out_none = jax.block_until_ready(
        temporal_loss(embeddings[0], temporal_order[0], uncertainties[0]))
    ref_none = _reference_single(embeddings[0], temporal_order[0],
                                 uncertainties[0])
    assert jnp.allclose(out_none, ref_none, rtol=1e-4, atol=1e-4), (out_none,
                                                                    ref_none)

    print("KERNEL_OK")
</pallas_src>

<mosaic_0001>
module attributes {stable_mosaic.version = 11 : i64} {
  func.func @_temporal_loss_kernel(%arg0: i32, %arg1: memref<16x8x32xf32, #tpu.memory_space<vmem>>, %arg2: memref<16x8xf32, #tpu.memory_space<vmem>>, %arg3: memref<16x8xf32, #tpu.memory_space<vmem>>, %arg4: memref<16x8x4xf32, #tpu.memory_space<vmem>>, %arg5: memref<16x8x4xf32, #tpu.memory_space<vmem>>, %arg6: memref<1x1x16xf32, #tpu.memory_space<vmem>>) attributes {dimension_semantics = [#tpu.dimension_semantics<parallel>], iteration_bounds = array<i64: 2>, scalar_prefetch = 0 : i64, scratch_operands = 0 : i64, tpu.core_type = #tpu.core_type<tc>, window_params = [{transform_indices = @transform_0, window_bounds = array<i64: 16, 8, 32>}, {transform_indices = @transform_1, window_bounds = array<i64: 16, 8>}, {transform_indices = @transform_2, window_bounds = array<i64: 16, 8>}, {transform_indices = @transform_3, window_bounds = array<i64: 16, 8, 4>}, {transform_indices = @transform_4, window_bounds = array<i64: 16, 8, 4>}, {transform_indices = @transform_5, window_bounds = array<i64: 1, 1, 16>}]} {
    %c0 = arith.constant 0 : index
    %c0_0 = arith.constant 0 : index
    %c0_1 = arith.constant 0 : index
    %0 = vector.load %arg1[%c0, %c0_0, %c0_1] : memref<16x8x32xf32, #tpu.memory_space<vmem>>, vector<16x8x32xf32>
    %c0_2 = arith.constant 0 : index
    %c0_3 = arith.constant 0 : index
    %1 = vector.load %arg2[%c0_2, %c0_3] : memref<16x8xf32, #tpu.memory_space<vmem>>, vector<16x8xf32>
    %c0_4 = arith.constant 0 : index
    %c0_5 = arith.constant 0 : index
    %2 = vector.load %arg3[%c0_4, %c0_5] : memref<16x8xf32, #tpu.memory_space<vmem>>, vector<16x8xf32>
    %cst = arith.constant dense<0.000000e+00> : vector<16x8x8xf32>
    %3 = tpu.matmul %0, %0, %cst {dimension_numbers = #tpu.dot_dimension_numbers<[2], [2], [1], [1], [0, 0, 0, 1, 1, 1], [0], [0]>} : vector<16x8x32xf32>, vector<16x8x32xf32>, vector<16x8x8xf32> -> vector<16x8x8xf32>
    %4 = arith.mulf %0, %0 : vector<16x8x32xf32>
    %cst_6 = arith.constant dense<0.000000e+00> : vector<16x8xf32>
    %5 = vector.multi_reduction <add>, %4, %cst_6 [2] : vector<16x8x32xf32> to vector<16x8xf32>
    %6 = vector.shape_cast %5 : vector<16x8xf32> to vector<16x8x1xf32>
    %7 = vector.shape_cast %5 : vector<16x8xf32> to vector<16x1x8xf32>
    %8 = vector.broadcast %6 : vector<16x8x1xf32> to vector<16x8x8xf32>
    %9 = vector.broadcast %7 : vector<16x1x8xf32> to vector<16x8x8xf32>
    %10 = arith.addf %8, %9 : vector<16x8x8xf32>
    %cst_7 = arith.constant 2.000000e+00 : f32
    %11 = vector.broadcast %cst_7 : f32 to vector<16x8x8xf32>
    %12 = arith.mulf %11, %3 : vector<16x8x8xf32>
    %13 = arith.subf %10, %12 : vector<16x8x8xf32>
    %cst_8 = arith.constant 0.000000e+00 : f32
    %14 = vector.broadcast %cst_8 : f32 to vector<16x8x8xf32>
    %15 = arith.maximumf %13, %14 : vector<16x8x8xf32>
    %16 = math.sqrt %15 : vector<16x8x8xf32>
    %17 = vector.shape_cast %1 : vector<16x8xf32> to vector<16x8x1xf32>
    %18 = vector.shape_cast %1 : vector<16x8xf32> to vector<16x1x8xf32>
    %19 = vector.broadcast %17 : vector<16x8x1xf32> to vector<16x8x8xf32>
    %20 = vector.broadcast %18 : vector<16x1x8xf32> to vector<16x8x8xf32>
    %21 = arith.subf %19, %20 : vector<16x8x8xf32>
    %22 = math.absf %21 : vector<16x8x8xf32>
    %23 = arith.subf %16, %22 : vector<16x8x8xf32>
    %24 = arith.mulf %23, %23 : vector<16x8x8xf32>
    %cst_9 = arith.constant dense<0.000000e+00> : vector<16x8xf32>
    %25 = vector.multi_reduction <add>, %24, %cst_9 [2] : vector<16x8x8xf32> to vector<16x8xf32>
    %cst_10 = arith.constant dense<0.000000e+00> : vector<16xf32>
    %26 = vector.multi_reduction <add>, %25, %cst_10 [1] : vector<16x8xf32> to vector<16xf32>
    %cst_11 = arith.constant 1.562500e-02 : f32
    %27 = vector.broadcast %cst_11 : f32 to vector<16xf32>
    %28 = arith.mulf %26, %27 : vector<16xf32>
    %cst_12 = arith.constant dense<0.000000e+00> : vector<16x8xf32>
    %29 = vector.multi_reduction <add>, %22, %cst_12 [2] : vector<16x8x8xf32> to vector<16x8xf32>
    %cst_13 = arith.constant 1.250000e-01 : f32
    %30 = vector.broadcast %cst_13 : f32 to vector<16x8xf32>
    %31 = arith.mulf %29, %30 : vector<16x8xf32>
    %32 = arith.subf %2, %31 : vector<16x8xf32>
    %33 = arith.mulf %32, %32 : vector<16x8xf32>
    %cst_14 = arith.constant dense<0.000000e+00> : vector<16xf32>
    %34 = vector.multi_reduction <add>, %33, %cst_14 [1] : vector<16x8xf32> to vector<16xf32>
    %cst_15 = arith.constant 1.250000e-01 : f32
    %35 = vector.broadcast %cst_15 : f32 to vector<16xf32>
    %36 = arith.mulf %34, %35 : vector<16xf32>
    %cst_16 = arith.constant 5.000000e-01 : f32
    %37 = vector.broadcast %cst_16 : f32 to vector<16xf32>
    %38 = arith.mulf %37, %36 : vector<16xf32>
    %39 = arith.addf %28, %38 : vector<16xf32>
    %c0_17 = arith.constant 0 : index
    %c0_18 = arith.constant 0 : index
    %c0_19 = arith.constant 0 : index
    %40 = vector.load %arg4[%c0_17, %c0_18, %c0_19] : memref<16x8x4xf32, #tpu.memory_space<vmem>>, vector<16x8x4xf32>
    %c0_20 = arith.constant 0 : index
    %c0_21 = arith.constant 0 : index
    %c0_22 = arith.constant 0 : index
    %41 = vector.load %arg5[%c0_20, %c0_21, %c0_22] : memref<16x8x4xf32, #tpu.memory_space<vmem>>, vector<16x8x4xf32>
    %42 = arith.subf %40, %41 : vector<16x8x4xf32>
    %43 = arith.mulf %42, %42 : vector<16x8x4xf32>
    %cst_23 = arith.constant dense<0.000000e+00> : vector<16x8xf32>
    %44 = vector.multi_reduction <add>, %43, %cst_23 [2] : vector<16x8x4xf32> to vector<16x8xf32>
    %cst_24 = arith.constant dense<0.000000e+00> : vector<16xf32>
    %45 = vector.multi_reduction <add>, %44, %cst_24 [1] : vector<16x8xf32> to vector<16xf32>
    %cst_25 = arith.constant 3.125000e-02 : f32
    %46 = vector.broadcast %cst_25 : f32 to vector<16xf32>
    %47 = arith.mulf %45, %46 : vector<16xf32>
    %cst_26 = arith.constant 3.000000e-01 : f32
    %48 = vector.broadcast %cst_26 : f32 to vector<16xf32>
    %49 = arith.mulf %48, %47 : vector<16xf32>
    %50 = arith.addf %39, %49 : vector<16xf32>
    %51 = vector.shape_cast %50 : vector<16xf32> to vector<1x16xf32>
    %c0_27 = arith.constant 0 : index
    %c0_28 = arith.constant 0 : index
    %c0_29 = arith.constant 0 : index
    %52 = vector.load %arg6[%c0_27, %c0_28, %c0_29] : memref<1x1x16xf32, #tpu.memory_space<vmem>>, vector<1x1x16xf32>
    %53 = vector.shape_cast %52 : vector<1x1x16xf32> to vector<1x16xf32>
    %54 = vector.shape_cast %51 : vector<1x16xf32> to vector<1x1x16xf32>
    tpu.vector_store %arg6[%c0_27, %c0_28, %c0_29], %54 {strides = array<i32>} : memref<1x1x16xf32, #tpu.memory_space<vmem>>, vector<1x1x16xf32>,
    return
  }
  func.func @transform_0(%arg0: i32) -> (i32, i32, i32) {
    %c0_i32 = arith.constant 0 : i32
    %c0_i32_0 = arith.constant 0 : i32
    %c0_i32_1 = arith.constant 0 : i32
    return %arg0, %c0_i32, %c0_i32_0 : i32, i32, i32
  }
  func.func @transform_1(%arg0: i32) -> (i32, i32) {
    %c0_i32 = arith.constant 0 : i32
    %c0_i32_0 = arith.constant 0 : i32
    return %arg0, %c0_i32 : i32, i32
  }
  func.func @transform_2(%arg0: i32) -> (i32, i32) {
    %c0_i32 = arith.constant 0 : i32
    %c0_i32_0 = arith.constant 0 : i32
    return %arg0, %c0_i32 : i32, i32
  }
  func.func @transform_3(%arg0: i32) -> (i32, i32, i32) {
    %c0_i32 = arith.constant 0 : i32
    %c0_i32_0 = arith.constant 0 : i32
    %c0_i32_1 = arith.constant 0 : i32
    return %arg0, %c0_i32, %c0_i32_0 : i32, i32, i32
  }
  func.func @transform_4(%arg0: i32) -> (i32, i32, i32) {
    %c0_i32 = arith.constant 0 : i32
    %c0_i32_0 = arith.constant 0 : i32
    %c0_i32_1 = arith.constant 0 : i32
    return %arg0, %c0_i32, %c0_i32_0 : i32, i32, i32
  }
  func.func @transform_5(%arg0: i32) -> (i32, i32, i32) {
    %c0_i32 = arith.constant 0 : i32
    %c0_i32_0 = arith.constant 0 : i32
    %c0_i32_1 = arith.constant 0 : i32
    return %arg0, %c0_i32, %c0_i32_0 : i32, i32, i32
  }
}

</mosaic_0001>

<bundles_post_ra>
// kernel: tpu_custom_call.1
= control target key start
LH: loop header
LB: loop body
LE: loop exit
PB: predicated region body
PF: predicated region fallthrough
CT: control target
= control target key end

     0   :  { %10 = vsyncpa [#allocation3], 0  ;;  %s4329_s0 = inlined_call_operand.vmem [shape: f32[32,8,32], index: 0, kind: input, shape index: {}]   ;;  %s4330_s1 = inlined_call_operand.vmem [shape: f32[32,8], index: 1, kind: input, shape index: {}]   ;;  %s4331_s2 = inlined_call_operand.vmem [shape: f32[32,8], index: 2, kind: input, shape index: {}]   ;;  %s4332_s3 = inlined_call_operand.vmem [shape: f32[32,8,4], index: 3, kind: input, shape index: {}]   ;;  %s4333_s4 = inlined_call_operand.vmem [shape: f32[32,8,4], index: 4, kind: input, shape index: {}]   ;;  %s4334_s5 = inlined_call_operand.hbm [shape: f32[2,1,16], index: 5, kind: output, shape index: {}]  }
   0x1   :  { %12 = vsyncpa [#allocation3 + $0x1], 0  ;;  %s3313_s18 = smov 0   ;;  %s3315_s19 = smov 0  }
   0x2   :  { %s3317_s20 = smov 0   ;;  %s3319_s21 = smov 0  }
   0x3 LB: > { %s3334_s22 = sadd.s32 4294967295, %s3277_s21   ;;  %s2980_s23 = sadd.s32 4294967294, %s3277_s21   ;;  %s3277_s21 = sphi %s3319_s21, %s4377_s21   ;;  %s3273_s20 = sphi %s3317_s20, %s4376_s20   ;;  %s3269_s19 = sphi %s3315_s19, %s4375_s19   ;;  %s3265_s18 = sphi %s3313_s18, %s4374_s18  }
   0x4   : > { %s3338_s24 = sadd.s32 1, %s3277_s21   ;;  %s155_s25 = sadd.s32 1, %s3273_s20 }
   0x5   : > { %s152_s26 = ssub.s32 %s3277_s21, %s3338_s24  ;;  %p165_p0 = scmp.ne.s32.totalorder %s3273_s20, %s3269_s19 }
   0x6   : > { %p153_p1 = scmp.eq.s32.totalorder %s152_s26, 0  ;;  %p166_p2 = scmp.eq.s32.totalorder %s3334_s22, 1 }
   0x7   : > { %p171_p3 = scmp.ne.s32.totalorder %s3269_s19, %s3265_s18  ;;  %p172_p4 = scmp.eq.s32.totalorder %s2980_s23, 1 }
   0x8   : > { %s3349_s27 = scalar_select %p153_p1, %s3273_s20, %s155_s25  }
   0x9   : > { %p3351_p5 = por %p166_p2, %p165_p0  ;;  %p3355_p6 = por %p172_p4, %p171_p3 }
   0xa   : > { %p2983_p7 = scmp.ge.s32.totalorder %s3277_s21, 1  ;;  %p235_p8 = scmp.lt.s32.totalorder %s3277_s21, 3 }
   0xc   : > { %p236_p9 = pnand %p2983_p7, %p235_p8 }
   0xe   : > { %239 = sbr.rel (%p236_p9) target bundleno = 611 (0x263), region = 40 }
  0x13   : > { %s3362_s30 = sshll.u32 %s3334_s22, 4  ;;  %v3279_v0 = vmov 0.0   ;;  %vm3280_vm0 = vmmov 0   ;;  %vm332_vm1 = vcmask 261120   ;;  %s2986_s11 = sshll.u32 %s3334_s22, 1  ;;  %v1581_v49 = vlaneseq }
  0x14   : > { %3061 = vmatprep.subr.mxu0 %v3279_v0  ;;  %3066 = vmatprep.subr.mxu1 %v3279_v0  ;;  %p283_p10 = scmp.lt.s32.totalorder %s3362_s30, 31  ;;  %p289_p11 = scmp.lt.s32.totalorder %s2986_s11, 3  ;;  %vm2298_vm2 = vcmask 64512   ;;  %vm2691_vm3 = vcmask 31744  }
  0x15   : > { %3063 = vmatprep.mubr.msk.f32.mxu0 %vm3280_vm0, %v3279_v0  ;;  %3068 = vmatprep.mubr.msk.f32.mxu1 %vm3280_vm0, %v3279_v0  ;;  %v3521_v50 = vshrl.u32 %v1581_v49, 7  ;;  %s280_s9 = sand.u32 1, %s3269_s19   ;;  %s4294_s14 = scalar_lea.hbm %s4334_s5, %s3362_s30 }
  0x16   : > { %s284_s6 = scalar_select %p283_p10, %s3362_s30, 31 }
  0x17   : > { %s4379_s11 = smov (!%p289_p11, %s2986_s11), 3  ;;  %4346 = vst [vmem:[#allocation5_spill] sm:$0xff] %v3521_v50  ;;  %v1951_v51 = vsub.s32 1, %v3521_v50  ;;  %v3533_v54 = vsub.s32 0, %v3521_v50  ;;  %v1958_v58 = vsub.s32 2, %v3521_v50  ;;  %v1965_v61 = vsub.s32 3, %v3521_v50 }
  0x18   : > { %s3372_s7 = sshll.u32 %s284_s6, 3  ;;  %s2987_s12 = sshll.u32 %s4379_s11, 3 }
  0x19   : > { %s3378_s10 = scalar_lea.vmem %s4329_s0, %s3372_s7  ;;  %s292_s15 = scalar_lea.vmem %s4330_s1, %s2987_s12 }
  0x1a   : > { %v312_v1 = vld [vmem:[%s3378_s10] sm:$0xff]  ;;  %v313_v2 = vld [vmem:[%s3378_s10 + $0x8] sm:$0xff]  ;;  %v314_v11 = vld [vmem:[%s3378_s10 + $0x10] sm:$0xff]  ;;  %s3587_s22 = scalar_lea.vmem %s4332_s3, %s3372_s7  ;;  %s3593_s26 = scalar_lea.vmem %s4333_s4, %s3372_s7 }
  0x1b   : > { %v3383_v3 = vld [vmem:[%s3378_s10 + $0x40] sm:$0xff]  ;;  %3062 = vmatpush3.xpose.msk.msra.mxu0 %vm332_vm1, %v312_v1  ;;  %3067 = vmatpush3.xpose.msk.msra.mxu1 %vm332_vm1, %v313_v2  ;;  %v1501_v5 = vmul.f32 %v312_v1, %v312_v1  ;;  %v3390_v6 = vld [vmem:[%s3378_s10 + $0x48] sm:$0xff]  ;;  %v1502_v8 = vmul.f32 %v313_v2, %v313_v2  ;;  %v315_v12 = vld [vmem:[%s3378_s10 + $0x18] sm:$0xff]  ;;  %v1503_v17 = vmul.f32 %v314_v11, %v314_v11  ;;  %s298_s8 = scalar_lea.vmem %s4331_s2, %s2987_s12  ;;  %s3282_s17 = smov [#allocation2]  }
  0x1c   : > { %v1509_v4 = vmul.f32 %v3383_v3, %v3383_v3  ;;  %3076 = vmatprep.subr.mxu1 %v3279_v0  ;;  %3071 = vmatprep.subr.mxu0 %v3279_v0  ;;  %v1510_v7 = vmul.f32 %v3390_v6, %v3390_v6  ;;  %v3401_v13 = vld [vmem:[%s3378_s10 + $0x50] sm:$0xff]  ;;  %v316_v18 = vld [vmem:[%s3378_s10 + $0x20] sm:$0xff]  ;;  %v317_v19 = vld [vmem:[%s3378_s10 + $0x28] sm:$0xff]  ;;  %v1504_v24 = vmul.f32 %v315_v12, %v315_v12 }
  0x1d   : > { %v1517_v10 = vsel %vm332_vm1, %v1501_v5, 0.0  ;;  %v1520_v15 = vsel %vm332_vm1, %v1502_v8, 0.0  ;;  %v1511_v16 = vmul.f32 %v3401_v13, %v3401_v13  ;;  %v3419_v20 = vld [vmem:[%s3378_s10 + $0x58] sm:$0xff]  ;;  %v1523_v22 = vsel %vm332_vm1, %v1503_v17, 0.0  ;;  %v318_v25 = vld [vmem:[%s3378_s10 + $0x30] sm:$0xff]  ;;  %v3438_v27 = vld [vmem:[%s3378_s10 + $0x60] sm:$0xff] }
  0x1e   : > { %v1541_v9 = vsel %vm332_vm1, %v1509_v4, 0.0  ;;  %3069 = vmatmul.mubr.msk.f32.vlgmr.msra.gmra.mxu1 %vm332_vm1, %v313_v2  ;;  %1518 = vadd.xlane.f32.xlu0 %v1517_v10  ;;  %v1544_v14 = vsel %vm332_vm1, %v1510_v7, 0.0  ;;  %v1512_v23 = vmul.f32 %v3419_v20, %v3419_v20  ;;  %v319_v26 = vld [vmem:[%s3378_s10 + $0x38] sm:$0xff]  ;;  %v1526_v29 = vsel %vm332_vm1, %v1504_v24, 0.0  ;;  %v325_v32 = vld [vmem:[%s3378_s10 + $0x68] sm:$0xff]  ;;  %v326_v37 = vld [vmem:[%s3378_s10 + $0x70] sm:$0xff] }
  0x1f   : > { %1542 = vadd.xlane.f32.xlu1 %v1541_v9  ;;  %3064 = vmatmul.mubr.msk.f32.vlgmr.msra.gmra.mxu0 %vm332_vm1, %v312_v1  ;;  %v1547_v21 = vsel %vm332_vm1, %v1511_v16, 0.0  ;;  %v1513_v30 = vmul.f32 %v3438_v27, %v3438_v27  ;;  %v1505_v31 = vmul.f32 %v316_v18, %v316_v18  ;;  %v1514_v35 = vmul.f32 %v325_v32, %v325_v32  ;;  %v327_v42 = vld [vmem:[%s3378_s10 + $0x78] sm:$0xff]  ;;  %v3529_v52 = vld [vmem:[%s292_s15] sm:$0xff]  ;;  %v329_v55 = vld [vmem:[%s292_s15 + $0x8] sm:$0xff]  ;;  %s281_s10 = scalar_lea.vmem [#allocation2], %s280_s9  ;;  %s2865_s15 = scalar_lea.sflag [#allocation3], %s280_s9 }
  0x20   : > { %3072 = vmatpush3.xpose.msk.msra.mxu0 %vm332_vm1, %v314_v11  ;;  %3077 = vmatpush3.xpose.msk.msra.mxu1 %vm332_vm1, %v315_v12  ;;  %v1550_v28 = vsel %vm332_vm1, %v1512_v23, 0.0  ;;  %v1506_v36 = vmul.f32 %v317_v19, %v317_v19  ;;  %v1515_v40 = vmul.f32 %v326_v37, %v326_v37  ;;  %v1507_v41 = vmul.f32 %v318_v25, %v318_v25  ;;  %s2877_s11 = sshll.u32 %s281_s10, 4  ;;  %s2878_s11 = int_to_ptr.vmem [resolvable:$true] %s2877_s11 }
  0x21   : > { %3073 = vmatprep.mubr.msk.f32.mxu0 %vm3280_vm0, %v3279_v0  ;;  %3078 = vmatprep.mubr.msk.f32.mxu1 %vm3280_vm0, %v3279_v0  ;;  %v1553_v33 = vsel %vm332_vm1, %v1513_v30, 0.0  ;;  %v1529_v34 = vsel %vm332_vm1, %v1505_v31, 0.0  ;;  %v1556_v38 = vsel %vm332_vm1, %v1514_v35, 0.0  ;;  %v1516_v45 = vmul.f32 %v327_v42, %v327_v42  ;;  %s3217_s16 = scalar_lea.vmem %s2878_s11, 16 }
  0x22   : > { %3086 = vmatprep.subr.mxu1 %v3279_v0  ;;  %1521 = vadd.xlane.f32.xlu0 %v1520_v15  ;;  %v1532_v39 = vsel %vm332_vm1, %v1506_v36, 0.0  ;;  %v1559_v43 = vsel %vm332_vm1, %v1515_v40, 0.0  ;;  %v1535_v44 = vsel %vm332_vm1, %v1507_v41, 0.0  ;;  %v1508_v46 = vmul.f32 %v319_v26, %v319_v26  ;;  %p3218_p12 = scmp.ne.s32.totalorder %s2878_s11, %s3217_s16 }
  0x23   : > { %1545 = vadd.xlane.f32.xlu1 %v1544_v14  ;;  %3079 = vmatmul.mubr.msk.f32.vlgmr.msra.gmra.mxu1 %vm332_vm1, %v315_v12  ;;  %v1562_v47 = vsel %vm332_vm1, %v1516_v45, 0.0  ;;  %v1952_v53 = vrot.slane %v3529_v52, %v1951_v51  ;;  %v2001_v56 = vrot.slane %v329_v55, %v3533_v54  ;;  %v1945_v57 = vrot.slane %v3529_v52, %v3533_v54 }
  0x24   : > { %3074 = vmatmul.mubr.msk.f32.vlgmr.msra.gmra.mxu0 %vm332_vm1, %v314_v11  ;;  %3081 = vmatprep.subr.mxu0 %v3279_v0  ;;  %v1538_v48 = vsel %vm332_vm1, %v1508_v46, 0.0  ;;  %v2008_v59 = vrot.slane %v329_v55, %v1951_v51  ;;  %v1959_v60 = vrot.slane %v3529_v52, %v1958_v58  ;;  %v2015_v62 = vrot.slane %v329_v55, %v1958_v58  ;;  %v2628_v51 = vld [vmem:[%s3587_s22 + $0x8] sm:$0xff]  ;;  %p3219_p13 = pnand %p3218_p12, %p3351_p5 }
  0x25   : > { %3082 = vmatpush3.xpose.msk.msra.mxu0 %vm332_vm1, %v316_v18  ;;  %3087 = vmatpush3.xpose.msk.msra.mxu1 %vm332_vm1, %v317_v19  ;;  %v1966_v63 = vrot.slane %v3529_v52, %v1965_v61  ;;  %v2022_v1 = vrot.slane %v329_v55, %v1965_v61  ;;  %v1993_v9 = vsub.s32 7, %v3521_v50  ;;  %v3281_v17 = vmov 1966171168   ;;  %v2627_v61 = vld [vmem:[%s3587_s22] sm:$0xff] }
  0x26   : > { %3083 = vmatprep.mubr.msk.f32.mxu0 %vm3280_vm0, %v3279_v0  ;;  %3088 = vmatprep.mubr.msk.f32.mxu1 %vm3280_vm0, %v3279_v0  ;;  %v3579_v35 = vand.u32 127, %v1581_v49  ;;  %p3220_p0 = pneg %p3219_p13 }
  0x27   : > { %1548 = vadd.xlane.f32.xlu1 %v1547_v21  ;;  %3096 = vmatprep.subr.mxu1 %v3279_v0  ;;  %v1994_v11 = vrot.slane %v3529_v52, %v1993_v9  ;;  %v2050_v12 = vrot.slane %v329_v55, %v1993_v9 }
  0x28   : > { %3089 = vmatmul.mubr.msk.f32.vlgmr.msra.gmra.mxu1 %vm332_vm1, %v317_v19  ;;  %1524 = vadd.xlane.f32.xlu0 %v1523_v22  ;;  %4347 = vst [vmem:[#allocation6_spill] sm:$0xff] %v3579_v35 }
  0x29   : > { %3084 = vmatmul.mubr.msk.f32.vlgmr.msra.gmra.mxu0 %vm332_vm1, %v316_v18  ;;  %3091 = vmatprep.subr.mxu0 %v3279_v0  ;;  %v2058_v18 = vunpack.c.l.s4 %v3281_v17  ;;  %v2637_v17 = vld [vmem:[%s3587_s22 + $0x50] sm:$0xff] }
  0x2a   : > { %3092 = vmatpush3.xpose.msk.msra.mxu0 %vm332_vm1, %v318_v25  ;;  %3097 = vmatpush3.xpose.msk.msra.mxu1 %vm332_vm1, %v319_v26 }
  0x2b   : > { %3093 = vmatprep.mubr.msk.f32.mxu0 %vm3280_vm0, %v3279_v0  ;;  %3098 = vmatprep.mubr.msk.f32.mxu1 %vm3280_vm0, %v3279_v0  ;;  %v2059_v21 = vunpack.c.0.s8 %v2058_v18  ;;  %v2653_v18 = vld [vmem:[%s3593_s26 + $0x50] sm:$0xff] }
  0x2c   : > { %1551 = vadd.xlane.f32.xlu1 %v1550_v28  ;;  %3106 = vmatprep.subr.mxu1 %v3279_v0 }
  0x2d   : > { %3099 = vmatmul.mubr.msk.f32.vlgmr.msra.gmra.mxu1 %vm332_vm1, %v319_v26  ;;  %1527 = vadd.xlane.f32.xlu0 %v1526_v29  ;;  %v2062_v24 = vsub.s32 %v2059_v21, %v3521_v50  ;;  %v2105_v29 = vcombine.high %v329_v55, %v329_v55 }
  0x2e   : > { %3094 = vmatmul.mubr.msk.f32.vlgmr.msra.gmra.mxu0 %vm332_vm1, %v318_v25  ;;  %3101 = vmatprep.subr.mxu0 %v3279_v0 }
  0x2f   : > { %3102 = vmatpush3.xpose.msk.msra.mxu0 %vm332_vm1, %v3383_v3  ;;  %3107 = vmatpush3.xpose.msk.msra.mxu1 %vm332_vm1, %v3390_v6  ;;  %v2112_v28 = vrot.slane %v329_v55, %v2062_v24  ;;  %v2119_v36 = vrot.slane %v2105_v29, %v2062_v24 }
  0x30   : > { %3103 = vmatprep.mubr.msk.f32.mxu0 %vm3280_vm0, %v3279_v0  ;;  %3108 = vmatprep.mubr.msk.f32.mxu1 %vm3280_vm0, %v3279_v0 }
  0x31   : > { %1554 = vadd.xlane.f32.xlu1 %v1553_v33  ;;  %3116 = vmatprep.subr.mxu1 %v3279_v0  ;;  %v3615_v58 = vrot.slane %v2119_v36, %v2062_v24 }
  0x32   : > { %3109 = vmatmul.mubr.msk.f32.vlgmr.msra.gmra.mxu1 %vm332_vm1, %v3390_v6  ;;  %1530 = vadd.xlane.f32.xlu0 %v1529_v34  ;;  %v1986_v6 = vsub.s32 6, %v3521_v50  ;;  %v2120_v34 = vcombine.high %v2112_v28, %v2112_v28 }
  0x33   : > { %3104 = vmatmul.mubr.msk.f32.vlgmr.msra.gmra.mxu0 %vm332_vm1, %v3383_v3  ;;  %3111 = vmatprep.subr.mxu0 %v3279_v0  ;;  %v1979_v3 = vsub.s32 5, %v3521_v50 }
  0x34   : > { %3112 = vmatpush3.xpose.msk.msra.mxu0 %vm332_vm1, %v3401_v13  ;;  %3117 = vmatpush3.xpose.msk.msra.mxu1 %vm332_vm1, %v3419_v20  ;;  %v1987_v8 = vrot.slane %v3529_v52, %v1986_v6  ;;  %v2043_v10 = vrot.slane %v329_v55, %v1986_v6  ;;  %v2652_v6 = vld [vmem:[%s3593_s26 + $0x48] sm:$0xff] }
  0x35   : > { %3113 = vmatprep.mubr.msk.f32.mxu0 %vm3280_vm0, %v3279_v0  ;;  %3118 = vmatprep.mubr.msk.f32.mxu1 %vm3280_vm0, %v3279_v0  ;;  %v1980_v5 = vrot.slane %v3529_v52, %v1979_v3  ;;  %v2036_v7 = vrot.slane %v329_v55, %v1979_v3 }
  0x36   : > { %1557 = vadd.xlane.f32.xlu1 %v1556_v38  ;;  %3126 = vmatprep.subr.mxu1 %v3279_v0 }
  0x37   : > { %3119 = vmatmul.mubr.msk.f32.vlgmr.msra.gmra.mxu1 %vm332_vm1, %v3419_v20  ;;  %1533 = vadd.xlane.f32.xlu0 %v1532_v39  ;;  %v3581_v39 = vrot.slane %v2112_v28, %v2062_v24 }
  0x38   : > { %3114 = vmatmul.mubr.msk.f32.vlgmr.msra.gmra.mxu0 %vm332_vm1, %v3401_v13  ;;  %3121 = vmatprep.subr.mxu0 %v3279_v0 }
  0x39   : > { %3122 = vmatpush3.xpose.msk.msra.mxu0 %vm332_vm1, %v3438_v27  ;;  %3127 = vmatpush3.xpose.msk.msra.mxu1 %vm332_vm1, %v325_v32  ;;  %v2150_v45 = vcombine.high %v3581_v39, %v3581_v39 }
  0x3a   : > { %3123 = vmatprep.mubr.msk.f32.mxu0 %vm3280_vm0, %v3279_v0  ;;  %3128 = vmatprep.mubr.msk.f32.mxu1 %vm3280_vm0, %v3279_v0 }
  0x3b   : > { %1560 = vadd.xlane.f32.xlu1 %v1559_v43  ;;  %3136 = vmatprep.subr.mxu1 %v3279_v0  ;;  %v2121_v43 = vcombine.high %v2119_v36, %v2119_v36  ;;  %v2629_v36 = vld [vmem:[%s3587_s22 + $0x10] sm:$0xff] }
  0x3c   : > { %3129 = vmatmul.mubr.msk.f32.vlgmr.msra.gmra.mxu1 %vm332_vm1, %v325_v32  ;;  %1536 = vadd.xlane.f32.xlu0 %v1535_v44  ;;  %v2056_v32 = vcombine.high %v3529_v52, %v3529_v52 }
  0x3d   : > { %3124 = vmatmul.mubr.msk.f32.vlgmr.msra.gmra.mxu0 %vm332_vm1, %v3438_v27  ;;  %3131 = vmatprep.subr.mxu0 %v3279_v0  ;;  %v2063_v27 = vrot.slane %v3529_v52, %v2062_v24 }
  0x3e   : > { %3132 = vmatpush3.xpose.msk.msra.mxu0 %vm332_vm1, %v326_v37  ;;  %3137 = vmatpush3.xpose.msk.msra.mxu1 %vm332_vm1, %v327_v42  ;;  %v2070_v40 = vrot.slane %v2056_v32, %v2062_v24  ;;  %v2640_v32 = vld [vmem:[%s3587_s22 + $0x68] sm:$0xff] }
  0x3f   : > { %3133 = vmatprep.mubr.msk.f32.mxu0 %vm3280_vm0, %v3279_v0  ;;  %3138 = vmatprep.mubr.msk.f32.mxu1 %vm3280_vm0, %v3279_v0  ;;  %v1972_v0 = vsub.s32 4, %v3521_v50  ;;  %v2071_v31 = vcombine.high %v2063_v27, %v2063_v27  ;;  %v2079_v38 = vrot.slane %v2063_v27, %v2062_v24 }
  0x40   : > { %1563 = vadd.xlane.f32.xlu1 %v1562_v47  ;;  %1539 = vadd.xlane.f32.xlu0 %v1538_v48  ;;  %v2072_v46 = vcombine.high %v2070_v40, %v2070_v40 }
  0x41   : > { %3139 = vmatmul.mubr.msk.f32.vlgmr.msra.gmra.mxu1 %vm332_vm1, %v327_v42  ;;  %3134 = vmatmul.mubr.msk.f32.vlgmr.msra.gmra.mxu0 %vm332_vm1, %v326_v37  ;;  %v1973_v2 = vrot.slane %v3529_v52, %v1972_v0  ;;  %v2029_v4 = vrot.slane %v329_v55, %v1972_v0  ;;  %v2093_v37 = vrot.slane %v2071_v31, %v2062_v24  ;;  %v2644_v52 = vld [vmem:[%s3593_s26 + $0x8] sm:$0xff] }
  0x42   : > { %v3597_v42 = vrot.slane %v2120_v34, %v2062_v24  ;;  %v2101_v47 = vcombine.high %v2079_v38, %v2079_v38  ;;  %v3632_v3 = vrot.slane %v2072_v46, %v2062_v24  ;;  %v2669_v46 = vsub.f32 %v2637_v17, %v2653_v18  ;;  %v2647_v17 = vld [vmem:[%s3593_s26 + $0x20] sm:$0xff]  ;;  %v2641_v18 = vld [vmem:[%s3587_s22 + $0x70] sm:$0xff] }
  0x43   : > { %v2103_v49 = vcombine.high %v2093_v37, %v2093_v37  ;;  %v2161_v55 = vrot.slane %v2093_v37, %v3533_v54 }
  0x44   : > { %v2152_v48 = vcombine.high %v3597_v42, %v3597_v42  ;;  %v2104_v27 = vcombine.high %v3632_v3, %v3632_v3  ;;  %v2685_v31 = vmul.f32 %v2669_v46, %v2669_v46  ;;  %v2633_v46 = vld [vmem:[%s3587_s22 + $0x30] sm:$0xff] }
  0x46   : > { %v3641_v9 = vrot.slane %v2152_v48, %v3533_v54  ;;  %v2638_v48 = vld [vmem:[%s3587_s22 + $0x58] sm:$0xff] }
  0x51   : > { %1954 = vbcast.lane.b32.xlu1 %v1952_v53, 256  ;;  %v3609_v53 = vsub.s32 %v3579_v35, %v3521_v50  ;;  %v2648_v50 = vld [vmem:[%s3593_s26 + $0x28] sm:$0xff] }
  0x55   : > { %2003 = vbcast.lane.b32.xlu1 %v2001_v56, 256  ;;  %v2157_v56 = vrot.slane %v2079_v38, %v3533_v54 }
  0x56   : > { %1947 = vbcast.lane.b32.xlu0 %v1945_v57, 256  ;;  %v2632_v57 = vld [vmem:[%s3587_s22 + $0x28] sm:$0xff] }
  0x59   : > { %2010 = vbcast.lane.b32.xlu1 %v2008_v59, 256  ;;  %v3617_v59 = vrot.slane %v2070_v40, %v2062_v24 }
  0x5a   : > { %1961 = vbcast.lane.b32.xlu0 %v1959_v60, 256  ;;  %v3619_v60 = vrot.slane %v2121_v43, %v2062_v24 }
  0x5b   : > { %v2102_v21 = vcombine.high %v3617_v59, %v3617_v59 }
  0x5c   : > { %v2153_v24 = vcombine.high %v3619_v60, %v3619_v60 }
  0x5d   : > { %2017 = vbcast.lane.b32.xlu1 %v2015_v62, 256  ;;  %v2643_v62 = vld [vmem:[%s3593_s26] sm:$0xff] }
  0x5e   : > { %1968 = vbcast.lane.b32.xlu0 %v1966_v63, 256  ;;  %v2659_v28 = vsub.f32 %v2627_v61, %v2643_v62  ;;  %v2630_v62 = vld [vmem:[%s3587_s22 + $0x18] sm:$0xff] }
  0x61   : > { %2024 = vbcast.lane.b32.xlu1 %v2022_v1, 256 }
  0x62   : > { %1975 = vbcast.lane.b32.xlu0 %v1973_v2, 256  ;;  %v3630_v2 = vrot.slane %v2150_v45, %v3533_v54 }
  0x65   : > { %2031 = vbcast.lane.b32.xlu1 %v2029_v4, 256  ;;  %v2660_v4 = vsub.f32 %v2628_v51, %v2644_v52 }
  0x66   : > { %1982 = vbcast.lane.b32.xlu0 %v1980_v5, 256  ;;  %v2636_v5 = vld [vmem:[%s3587_s22 + $0x48] sm:$0xff] }
  0x67   : > { %v2668_v34 = vsub.f32 %v2636_v5, %v2652_v6  ;;  %v2676_v43 = vmul.f32 %v2660_v4, %v2660_v4  ;;  %v2646_v4 = vld [vmem:[%s3593_s26 + $0x18] sm:$0xff]  ;;  %v2639_v5 = vld [vmem:[%s3587_s22 + $0x60] sm:$0xff]  ;;  %v3680_v6 = vrot.slane %v2102_v21, %v3533_v54 }
  0x69   : > { %2038 = vbcast.lane.b32.xlu1 %v2036_v7, 256  ;;  %v2635_v7 = vld [vmem:[%s3587_s22 + $0x40] sm:$0xff] }
  0x6a   : > { %1989 = vbcast.lane.b32.xlu0 %v1987_v8, 256  ;;  %v3638_v8 = vrot.slane %v2101_v47, %v3533_v54  ;;  %v2645_v47 = vld [vmem:[%s3593_s26 + $0x10] sm:$0xff] }
  0x6b   : > { %v2661_v21 = vsub.f32 %v2629_v36, %v2645_v47 }
  0x6d   : > { %2045 = vbcast.lane.b32.xlu1 %v2043_v10, 256  ;;  %v3644_v10 = vrot.slane %v2103_v49, %v3533_v54  ;;  %v2654_v49 = vld [vmem:[%s3593_s26 + $0x58] sm:$0xff] }
  0x6e   : > { %1996 = vbcast.lane.b32.xlu0 %v1994_v11, 256  ;;  %v2151_v11 = vcombine.high %v3615_v58, %v3615_v58  ;;  %v2670_v1 = vsub.f32 %v2638_v48, %v2654_v49  ;;  %v2649_v48 = vld [vmem:[%s3593_s26 + $0x30] sm:$0xff] }
  0x70   : > { %v3674_v61 = vrot.slane %v2151_v11, %v3533_v54  ;;  %v2631_v11 = vld [vmem:[%s3587_s22 + $0x20] sm:$0xff] }
  0x71   : > { %2052 = vbcast.lane.b32.xlu1 %v2050_v12, 256  ;;  %v2651_v12 = vld [vmem:[%s3593_s26 + $0x40] sm:$0xff] }
  0x72   : > { %v2667_v45 = vsub.f32 %v2635_v7, %v2651_v12  ;;  %v3683_v7 = vrot.slane %v2153_v24, %v3533_v54  ;;  %v2655_v12 = vld [vmem:[%s3593_s26 + $0x60] sm:$0xff]  ;;  %v2656_v24 = vld [vmem:[%s3593_s26 + $0x68] sm:$0xff] }
  0x74   : > { %4351 = vst [vmem:[#allocation10_spill] sm:$0xff] %v3683_v7  ;;  %v2683_v40 = vmul.f32 %v2667_v45, %v2667_v45  ;;  %v2657_v45 = vld [vmem:[%s3593_s26 + $0x70] sm:$0xff]  ;;  %v2664_v7 = vsub.f32 %v2632_v57, %v2648_v50 }
  0xa7   : > { %v3552_v14 = vpop.xlane.xlu0 %1518 }
  0xa8   : > { %v3550_v13 = vpop.xlane.xlu1 %1542 }
  0xab   : > { %v3556_v16 = vpop.xlane.xlu0 %1521 }
  0xac   : > { %v3554_v15 = vpop.xlane.xlu1 %1545 }
  0xb0   : > { %v3558_v19 = vpop.xlane.xlu1 %1548 }
  0xb1   : > { %v3560_v20 = vpop.xlane.xlu0 %1524 }
  0xb5   : > { %v3562_v22 = vpop.xlane.xlu1 %1551 }
  0xb6   : > { %v3564_v23 = vpop.xlane.xlu0 %1527 }
  0xba   : > { %v3567_v25 = vpop.xlane.xlu1 %1554 }
  0xbb   : > { %v3569_v26 = vpop.xlane.xlu0 %1530 }
  0xbf   : > { %v3572_v30 = vpop.xlane.xlu1 %1557 }
  0xc0   : > { %v3576_v33 = vpop.xlane.xlu0 %1533 }
  0xc4   : > { %v3595_v41 = vpop.xlane.xlu1 %1560 }
  0xc5   : > { %v3599_v44 = vpop.xlane.xlu0 %1536 }
  0xc9   : > { %v3623_v63 = vpop.xlane.xlu1 %1563  ;;  %v3625_v0 = vpop.xlane.xlu0 %1539 }
  0xca   : > { %4348 = vst [vmem:[#allocation7_spill] sm:$0xff] %v3623_v63  ;;  %v2686_v63 = vmul.f32 %v2670_v1, %v2670_v1 }
  0xcd   : > { %v1955_v37 = vpop.permute.xlu1 %1954  ;;  %v1948_v38 = vpop.permute.xlu0 %1947 }
  0xce   : > { %v3669_v51 = vsub.f32 %v1955_v37, %v2161_v55  ;;  %v3671_v52 = vsub.f32 %v1948_v38, %v2157_v56  ;;  %v3686_v55 = vrot.slane %v2104_v27, %v3533_v54  ;;  %v2675_v56 = vmul.f32 %v2659_v28, %v2659_v28 }
  0xcf   : > { %v2684_v38 = vmul.f32 %v2668_v34, %v2668_v34  ;;  %v3696_v28 = vsel %vm2691_vm3, %v2676_v43, 0.0  ;;  %v4353_v34 = vrot.slane %v3581_v39, %v3533_v54  ;;  %v2671_v39 = vsub.f32 %v2639_v5, %v2655_v12 }
  0xd0   : > { %4349 = vst [vmem:[#allocation8_spill] sm:$0xff] %v3669_v51  ;;  %4350 = vst [vmem:[#allocation9_spill] sm:$0xff] %v3671_v52  ;;  %v4354_v47 = vand.u32 2147483647, %v3669_v51  ;;  %v4355_v35 = vand.u32 2147483647, %v3671_v52 }
  0xd1   : > { %v2004_v27 = vpop.permute.xlu1 %2003  ;;  %v1962_v29 = vpop.permute.xlu0 %1961  ;;  %4352 = vst [vmem:[#allocation11_spill] sm:$0xff] %v3696_v28  ;;  %v2662_v28 = vsub.f32 %v2630_v62, %v2646_v4  ;;  %v3716_v49 = vsel %vm2691_vm3, %v2675_v56, 0.0  ;;  %v3721_v52 = vsel %vm2691_vm3, %v2684_v38, 0.0  ;;  %v4356_v56 = vrot.slane %v3597_v42, %v3533_v54 }
  0xd2   : > { %v3704_v36 = vsub.f32 %v2004_v27, %v4353_v34  ;;  %v2454_v37 = vsel %vm2298_vm2, %v4354_v47, 0.0  ;;  %v2451_v43 = vsel %vm2298_vm2, %v4355_v35, 0.0  ;;  %v2663_v27 = vsub.f32 %v2631_v11, %v2647_v17 }
  0xd3   : > { %2455 = vadd.xlane.f32.xlu1 %v2454_v37  ;;  %2452 = vadd.xlane.f32.xlu0 %v2451_v43  ;;  %v2672_v34 = vsub.f32 %v2640_v32, %v2656_v24  ;;  %v2236_v47 = vsub.f32 %v1962_v29, %v3638_v8  ;;  %v2677_v35 = vmul.f32 %v2661_v21, %v2661_v21  ;;  %v3732_v8 = vsel %vm2691_vm3, %v2683_v40, 0.0 }
  0xd4   : > { %v4340_v51 = vand.u32 2147483647, %v3704_v36  ;;  %v2673_v37 = vsub.f32 %v2641_v18, %v2657_v45  ;;  %v2665_v43 = vsub.f32 %v2633_v46, %v2649_v48  ;;  %v2678_v29 = vmul.f32 %v2662_v28, %v2662_v28 }
  0xd5   : > { %v2011_v62 = vpop.permute.xlu1 %2010  ;;  %v1969_v4 = vpop.permute.xlu0 %1968  ;;  %v3735_v12 = vsel %vm2691_vm3, %v2685_v31, 0.0  ;;  %v2687_v50 = vmul.f32 %v2671_v39, %v2671_v39  ;;  %v2679_v57 = vmul.f32 %v2663_v27, %v2663_v27  ;;  %v2688_v1 = vmul.f32 %v2672_v34, %v2672_v34 }
  0xd6   : > { %v3726_v5 = vsub.f32 %v2011_v62, %v4356_v56  ;;  %v2475_v32 = vsel %vm2298_vm2, %v4340_v51, 0.0  ;;  %v3738_v42 = vand.u32 2147483647, %v2236_v47  ;;  %v2237_v17 = vsub.f32 %v1969_v4, %v3644_v10 }
  0xd7   : > { %2476 = vadd.xlane.f32.xlu0 %v2475_v32  ;;  %v3742_v18 = vsel %vm2691_vm3, %v2677_v35, 0.0  ;;  %v3745_v21 = vsel %vm2691_vm3, %v2686_v63, 0.0  ;;  %v2680_v24 = vmul.f32 %v2664_v7, %v2664_v7  ;;  %v2689_v31 = vmul.f32 %v2673_v37, %v2673_v37 }
  0xd8   : > { %v4342_v11 = vand.u32 2147483647, %v3726_v5  ;;  %v2681_v28 = vmul.f32 %v2665_v43, %v2665_v43  ;;  %v1590_v45 = vrot.slane %v3556_v16, %v3609_v53  ;;  %v3754_v48 = vsel %vm2691_vm3, %v2678_v29, 0.0 }
  0xd9   : > { %v2018_v38 = vpop.permute.xlu1 %2017  ;;  %v1976_v40 = vpop.permute.xlu0 %1975  ;;  %v4357_v63 = vrot.slane %v3617_v59, %v3533_v54  ;;  %v3762_v7 = vsel %vm2691_vm3, %v2687_v50, 0.0  ;;  %v3765_v27 = vsel %vm2691_vm3, %v2679_v57, 0.0  ;;  %v1586_v34 = vrot.slane %v3552_v14, %v3609_v53 }
  0xda   : > { %v2244_v46 = vsub.f32 %v2018_v38, %v3630_v2  ;;  %v2478_v10 = vsel %vm2298_vm2, %v4342_v11, 0.0  ;;  %v3768_v2 = vsel %vm2691_vm3, %v2688_v1, 0.0  ;;  %v3774_v35 = vand.u32 2147483647, %v2237_v17 }
  0xdb   : > { %2479 = vadd.xlane.f32.xlu0 %v2478_v10  ;;  %v3759_v39 = vsub.f32 %v1976_v40, %v4357_v63  ;;  %v2457_v59 = vsel %vm2298_vm2, %v3738_v42, 0.0  ;;  %v1618_v62 = vrot.slane %v3550_v13, %v3609_v53  ;;  %v3781_v43 = vsel %vm2691_vm3, %v2680_v24, 0.0 }
  0xdc   : > { %v3772_v47 = vand.u32 2147483647, %v2244_v46  ;;  %v3784_v56 = vsel %vm2691_vm3, %v2689_v31, 0.0  ;;  %v3787_v32 = vsel %vm2691_vm3, %v2681_v28, 0.0  ;;  %v1767_v29 = vadd.f32 %v1590_v45, %v3556_v16 }
  0xdd   : > { %v2025_v4 = vpop.permute.xlu1 %2024  ;;  %v1983_v37 = vpop.permute.xlu0 %1982  ;;  %v1594_v50 = vrot.slane %v3560_v20, %v3609_v53  ;;  %v1598_v38 = vrot.slane %v3564_v23, %v3609_v53  ;;  %v2254_v40 = vand.u32 2147483647, %v3759_v39  ;;  %v4358_v16 = vrot.slane %v3632_v3, %v3533_v54 }
  0xde   : > { %v2245_v57 = vsub.f32 %v2025_v4, %v3641_v9  ;;  %v2481_v1 = vsel %vm2298_vm2, %v3772_v47, 0.0  ;;  %v475_v17 = vpop.f32.mrf.mxu1  ;;  %v1766_v9 = vadd.f32 %v1586_v34, %v3552_v14  ;;  %v2460_v46 = vsel %vm2298_vm2, %v3774_v35, 0.0 }
  0xdf   : > { %2482 = vadd.xlane.f32.xlu1 %v2481_v1  ;;  %2458 = vadd.xlane.f32.xlu0 %v2457_v59  ;;  %v402_v24 = vpop.f32.mrf.mxu0  ;;  %v1783_v31 = vmul.f32 2.0, %v475_v17  ;;  %v3801_v28 = vsub.f32 %v1983_v37, %v4358_v16  ;;  %v3809_v59 = vadd.f32 %v1618_v62, %v3550_v13  ;;  %v1622_v4 = vrot.slane %v3554_v15, %v3609_v53 }
  0xe0   : > { %v3804_v45 = vand.u32 2147483647, %v2245_v57  ;;  %v1782_v10 = vmul.f32 2.0, %v402_v24  ;;  %v3070_v63 = vpop.f32.mrf.mxu1  ;;  %v1626_v3 = vrot.slane %v3558_v19, %v3609_v53  ;;  %v1768_v14 = vadd.f32 %v1594_v50, %v3560_v20 }
  0xe1   : > { %v2032_v37 = vpop.permute.xlu1 %2031  ;;  %v1799_v1 = vsub.f32 %v1767_v29, %v1783_v31  ;;  %v3065_v17 = vpop.f32.mrf.mxu0  ;;  %v4359_v34 = vrot.slane %v3615_v58, %v3533_v54  ;;  %v1769_v16 = vadd.f32 %v1598_v38, %v3564_v23  ;;  %v2255_v29 = vand.u32 2147483647, %v3801_v28 }
  0xe2   : > { %v2484_v13 = vsel %vm2298_vm2, %v3804_v45, 0.0  ;;  %v1798_v62 = vsub.f32 %v1766_v9, %v1782_v10  ;;  %v1990_v24 = vpop.permute.xlu0 %1989  ;;  %v2463_v20 = vsel %vm2298_vm2, %v2254_v40, 0.0  ;;  %v1630_v23 = vrot.slane %v3562_v22, %v3609_v53 }
  0xe3   : > { %v3819_v57 = vsub.f32 %v2032_v37, %v4359_v34  ;;  %2485 = vadd.xlane.f32.xlu1 %v2484_v13  ;;  %2461 = vadd.xlane.f32.xlu0 %v2460_v46  ;;  %v3824_v63 = vmax.f32 %v1799_v1, 0.0  ;;  %v621_v58 = vpop.f32.mrf.mxu1  ;;  %v2240_v10 = vsub.f32 %v1990_v24, %v3680_v6  ;;  %v1602_v38 = vrot.slane %v3569_v26, %v3609_v53 }
  0xe4   : > { %v3831_v31 = vmax.f32 %v1798_v62, 0.0  ;;  %v548_v37 = vpop.f32.mrf.mxu0  ;;  %v1785_v9 = vmul.f32 2.0, %v621_v58  ;;  %v4360_v34 = vrot.slane %v3619_v60, %v3533_v54  ;;  %v1634_v51 = vrot.slane %v3567_v25, %v3609_v53 }
  0xe5   : > { %v4341_v50 = vand.u32 2147483647, %v3819_v57  ;;  %3185 = vrsqrt.f32 %v3824_v63  ;;  %v2039_v46 = vpop.permute.xlu1 %2038  ;;  %v1784_v1 = vmul.f32 2.0, %v548_v37  ;;  %v3080_v17 = vpop.f32.mrf.mxu1  ;;  %v1606_v37 = vrot.slane %v3576_v33, %v3609_v53 }
  0xe6   : > { %3187 = vrsqrt.f32 %v3831_v31  ;;  %v3843_v13 = vsub.f32 %v2039_v46, %v4360_v34  ;;  %v1801_v62 = vsub.f32 %v1769_v16, %v1785_v9  ;;  %v3075_v24 = vpop.f32.mrf.mxu0  ;;  %v1997_v58 = vpop.permute.xlu0 %1996  ;;  %v2466_v54 = vsel %vm2298_vm2, %v2255_v29, 0.0 }
  0xe7   : > { %v2487_v6 = vsel %vm2298_vm2, %v4341_v50, 0.0  ;;  %2464 = vadd.xlane.f32.xlu0 %v2463_v20  ;;  %v1800_v17 = vsub.f32 %v1768_v14, %v1784_v1  ;;  %v3858_v16 = vand.u32 2147483647, %v2240_v10  ;;  %v2241_v34 = vsub.f32 %v1997_v58, %v3686_v55 }
  0xe8   : > { %2488 = vadd.xlane.f32.xlu1 %v2487_v6  ;;  %v4343_v60 = vand.u32 2147483647, %v3843_v13  ;;  %v3856_v46 = vmax.f32 %v1801_v62, 0.0  ;;  %v767_v9 = vpop.f32.mrf.mxu1  ;;  %v1770_v24 = vadd.f32 %v1602_v38, %v3569_v26  ;;  %v1638_v6 = vrot.slane %v3572_v30, %v3609_v53 }
  0xe9   : > { %v3864_v20 = vmax.f32 %v1800_v17, 0.0  ;;  %v2046_v14 = vpop.permute.xlu1 %2045  ;;  %v694_v1 = vpop.f32.mrf.mxu0  ;;  %v1787_v50 = vmul.f32 2.0, %v767_v9  ;;  %v1771_v26 = vadd.f32 %v1606_v37, %v3576_v33  ;;  %v1642_v38 = vrot.slane %v3595_v41, %v3609_v53 }
  0xea   : > { %3189 = vrsqrt.f32 %v3856_v46  ;;  %v2248_v62 = vsub.f32 %v2046_v14, %v3674_v61  ;;  %v2490_v10 = vsel %vm2298_vm2, %v4343_v60, 0.0  ;;  %v1786_v11 = vmul.f32 2.0, %v694_v1  ;;  %v3090_v55 = vpop.f32.mrf.mxu1 }
  0xeb   : > { %v1610_v58 = vrot.slane %v3599_v44, %v3609_v53  ;;  %3191 = vrsqrt.f32 %v3864_v20  ;;  %2467 = vadd.xlane.f32.xlu0 %v2466_v54  ;;  %v3085_v17 = vpop.f32.mrf.mxu0  ;;  %v3879_v14 = vand.u32 2147483647, %v2241_v34  ;;  %v2469_v1 = vsel %vm2298_vm2, %v3858_v16, 0.0  ;;  %v4361_v55 = vld [vmem:[#allocation10_spill] sm:$0xff] }
  0xec   : > { %2491 = vadd.xlane.f32.xlu1 %v2490_v10  ;;  %v3877_v61 = vand.u32 2147483647, %v2248_v62  ;;  %v1802_v9 = vsub.f32 %v1770_v24, %v1786_v11  ;;  %v1775_v33 = vadd.f32 %v1622_v4, %v3554_v15  ;;  %v3891_v37 = vadd.f32 %v1626_v3, %v3558_v19 }
  0xed   : > { %v1614_v54 = vrot.slane %v3625_v0, %v3609_v53  ;;  %v1803_v11 = vsub.f32 %v1771_v26, %v1787_v50  ;;  %v2053_v34 = vpop.permute.xlu1 %2052  ;;  %v913_v24 = vpop.f32.mrf.mxu1  ;;  %v3896_v62 = vadd.f32 %v1630_v23, %v3562_v22  ;;  %v3904_v19 = vadd.f32 %v1634_v51, %v3567_v25 }
  0xee   : > { %v3898_v10 = vmax.f32 %v1802_v9, 0.0  ;;  %v2249_v17 = vsub.f32 %v2053_v34, %v4361_v55  ;;  %v2493_v15 = vsel %vm2298_vm2, %v3877_v61, 0.0  ;;  %v840_v4 = vpop.f32.mrf.mxu0  ;;  %v3907_v3 = vadd.f32 %v1638_v6, %v3572_v30  ;;  %v4362_v9 = vld [vmem:[#allocation7_spill] sm:$0xff] }
  0xef   : > { %v1772_v50 = vadd.f32 %v1610_v58, %v3599_v44  ;;  %2470 = vadd.xlane.f32.xlu0 %v2469_v1  ;;  %v1788_v22 = vmul.f32 2.0, %v840_v4  ;;  %v3100_v23 = vpop.f32.mrf.mxu1  ;;  %v3911_v26 = vadd.f32 %v1642_v38, %v3595_v41  ;;  %v1646_v34 = vrot.slane %v4362_v9, %v3609_v53 }
  0xf0   : > { %2494 = vadd.xlane.f32.xlu1 %v2493_v15  ;;  %v3915_v55 = vand.u32 2147483647, %v2249_v17  ;;  %v3095_v60 = vpop.f32.mrf.mxu0  ;;  %v2472_v25 = vsel %vm2298_vm2, %v3879_v14, 0.0  ;;  %v1773_v30 = vadd.f32 %v1614_v54, %v3625_v0  ;;  %3193 = vrsqrt.f32 %v3898_v10 }
  0xf1   : > { %v3921_v44 = vmax.f32 %v1803_v11, 0.0  ;;  %v1804_v51 = vsub.f32 %v1772_v50, %v1788_v22  ;;  %v1789_v58 = vmul.f32 2.0, %v913_v24  ;;  %vm1839_vm4 = vcmp.eq.f32.partialorder %v3824_v63, inf }
  0xf2   : > { %v3186_v6 = vpop.eup %3185  ;;  %v2496_v41 = vsel %vm2298_vm2, %v3915_v55, 0.0  ;;  %v1059_v38 = vpop.f32.mrf.mxu1  ;;  %vm1841_vm5 = vcmp.eq.f32.partialorder %v3824_v63, 0.0  ;;  %v1842_v17 = vand.u32 2147483648, %v3824_v63  ;;  %vm1832_vm6 = vcmp.eq.f32.partialorder %v3831_v31, inf }
  0xf3   : > { %v3188_v60 = vpop.eup %3187  ;;  %v3927_v1 = vmax.f32 %v1804_v51, 0.0  ;;  %2473 = vadd.xlane.f32.xlu0 %v2472_v25  ;;  %v986_v0 = vpop.f32.mrf.mxu0  ;;  %v1791_v54 = vmul.f32 2.0, %v1059_v38  ;;  %v1838_v11 = vmul.f32 %v3186_v6, %v3824_v63  ;;  %vm1834_vm7 = vcmp.eq.f32.partialorder %v3831_v31, 0.0 }
  0xf4   : > { %2497 = vadd.xlane.f32.xlu1 %v2496_v41  ;;  %v1790_v24 = vmul.f32 2.0, %v986_v0  ;;  %v3110_v15 = vpop.f32.mrf.mxu1  ;;  %v1831_v4 = vmul.f32 %v3188_v60, %v3831_v31  ;;  %3195 = vrsqrt.f32 %v3921_v44  ;;  %v1835_v25 = vand.u32 2147483648, %v3831_v31 }
  0xf5   : > { %v1807_v50 = vsub.f32 %v1775_v33, %v1791_v54  ;;  %v3105_v22 = vpop.f32.mrf.mxu0  ;;  %v1840_v23 = vsel %vm1839_vm4, %v3824_v63, %v1838_v11  ;;  %v1805_v51 = vsub.f32 %v1773_v30, %v1789_v58  ;;  %3197 = vrsqrt.f32 %v3927_v1  ;;  %v4363_v33 = vld [vmem:[#allocation11_spill] sm:$0xff]  ;;  %v4364_v11 = vld [vmem:[#allocation8_spill] sm:$0xff] }
  0xf6   : > { %v1806_v6 = vsub.f32 %v3809_v59, %v1790_v24  ;;  %v1843_v41 = vsel %vm1841_vm5, %v1842_v17, %v1840_v23  ;;  %v1833_v38 = vsel %vm1832_vm6, %v3831_v31, %v1831_v4  ;;  %v4365_v15 = vand.u32 2147483647, %v4364_v11  ;;  %v4366_v4 = vld [vmem:[#allocation9_spill] sm:$0xff] }
  0xf7   : > { %v3190_v60 = vpop.eup %3189  ;;  %v3944_v0 = vmax.f32 %v1807_v50, 0.0  ;;  %2693 = vadd.xlane.f32.xlu0 %v3716_v49  ;;  %v1205_v54 = vpop.f32.mrf.mxu1  ;;  %v1836_v59 = vsel %vm1834_vm7, %v1835_v25, %v1833_v38  ;;  %v4367_v50 = vand.u32 2147483647, %v4366_v4  ;;  %v3962_v49 = vadd.f32 %v1646_v34, %v4362_v9 }
  0xf8   : > { %2696 = vadd.xlane.f32.xlu1 %v4363_v33  ;;  %v3950_v30 = vsub.f32 %v1843_v41, %v4365_v15  ;;  %v3192_v63 = vpop.eup %3191  ;;  %v3954_v58 = vmax.f32 %v1806_v6, 0.0  ;;  %v1132_v17 = vpop.f32.mrf.mxu0  ;;  %v1793_v24 = vmul.f32 2.0, %v1205_v54  ;;  %v1852_v23 = vmul.f32 %v3190_v60, %v3856_v46 }
  0xf9   : > { %v3958_v22 = vsub.f32 %v1836_v59, %v4367_v50  ;;  %3199 = vrsqrt.f32 %v3944_v0  ;;  %v1792_v41 = vmul.f32 2.0, %v1132_v17  ;;  %v3120_v33 = vpop.f32.mrf.mxu1  ;;  %vm1846_vm8 = vcmp.eq.f32.partialorder %v3864_v20, inf }
  0xfa   : > { %3201 = vrsqrt.f32 %v3954_v58  ;;  %v1809_v31 = vsub.f32 %v3896_v62, %v1793_v24  ;;  %v3115_v25 = vpop.f32.mrf.mxu0  ;;  %vm1848_vm9 = vcmp.eq.f32.partialorder %v3864_v20, 0.0  ;;  %v1849_v6 = vand.u32 2147483648, %v3864_v20 }
  0xfb   : > { %v1808_v38 = vsub.f32 %v3891_v37, %v1792_v41  ;;  %2717 = vadd.xlane.f32.xlu0 %v3732_v8  ;;  %v1845_v9 = vmul.f32 %v3192_v63, %v3864_v20  ;;  %vm1853_vm10 = vcmp.eq.f32.partialorder %v3856_v46, inf  ;;  %v1856_v34 = vand.u32 2147483648, %v3856_v46 }
  0xfc   : > { %2720 = vadd.xlane.f32.xlu1 %v3721_v52  ;;  %v3976_v60 = vmax.f32 %v1805_v51, 0.0  ;;  %v3978_v62 = vmax.f32 %v1809_v31, 0.0  ;;  %v1351_v54 = vpop.f32.mrf.mxu1  ;;  %v1854_v11 = vsel %vm1853_vm10, %v3856_v46, %v1852_v23  ;;  %vm1855_vm11 = vcmp.eq.f32.partialorder %v3856_v46, 0.0 }
  0xfd   : > { %v3982_v37 = vmax.f32 %v1808_v38, 0.0  ;;  %v1278_v52 = vpop.f32.mrf.mxu0  ;;  %v1795_v15 = vmul.f32 2.0, %v1351_v54  ;;  %v1847_v8 = vsel %vm1846_vm8, %v3864_v20, %v1845_v9  ;;  %v1857_v59 = vsel %vm1855_vm11, %v1856_v34, %v1854_v11  ;;  %v3194_v63 = vpop.eup %3193 }
  0xfe   : > { %3203 = vrsqrt.f32 %v3978_v62  ;;  %v1794_v51 = vmul.f32 2.0, %v1278_v52  ;;  %v3130_v17 = vpop.f32.mrf.mxu1  ;;  %v1850_v24 = vsel %vm1848_vm9, %v1849_v6, %v1847_v8  ;;  %v3991_v4 = vsub.f32 %v1857_v59, %v3774_v35 }
  0xff   : > { %vm1867_vm12 = vcmp.eq.f32.partialorder %v3921_v44, inf  ;;  %3205 = vrsqrt.f32 %v3982_v37  ;;  %v1811_v46 = vsub.f32 %v3907_v3, %v1795_v15  ;;  %v3125_v50 = vpop.f32.mrf.mxu0  ;;  %2699 = vadd.xlane.f32.xlu0 %v3742_v18  ;;  %v3999_v23 = vsub.f32 %v1850_v24, %v3738_v42 }
 0x100   : > { %2723 = vadd.xlane.f32.xlu1 %v3735_v12  ;;  %vm1860_vm13 = vcmp.eq.f32.partialorder %v3898_v10, inf  ;;  %v1810_v20 = vsub.f32 %v3904_v19, %v1794_v51  ;;  %vm1862_vm14 = vcmp.eq.f32.partialorder %v3898_v10, 0.0  ;;  %v1863_v35 = vand.u32 2147483648, %v3898_v10 }
 0x101   : > { %vm1869_vm15 = vcmp.eq.f32.partialorder %v3921_v44, 0.0  ;;  %3207 = vrsqrt.f32 %v3976_v60  ;;  %v4007_v3 = vmax.f32 %v1811_v46, 0.0  ;;  %v1424_v12 = vpop.f32.mrf.mxu0  ;;  %v1497_v41 = vpop.f32.mrf.mxu1  ;;  %v1859_v18 = vmul.f32 %v3194_v63, %v3898_v10 }
 0x102   : > { %v1870_v42 = vand.u32 2147483648, %v3921_v44  ;;  %v3196_v33 = vpop.eup %3195  ;;  %v4011_v31 = vmax.f32 %v1810_v20, 0.0  ;;  %v1796_v19 = vmul.f32 2.0, %v1424_v12  ;;  %v1797_v25 = vmul.f32 2.0, %v1497_v41 }
 0x103   : > { %vm1874_vm0 = vcmp.eq.f32.partialorder %v3927_v1, inf  ;;  %3209 = vrsqrt.f32 %v4007_v3  ;;  %2702 = vadd.xlane.f32.xlu0 %v3754_v48  ;;  %v3135_v6 = vpop.f32.mrf.mxu0  ;;  %v3140_v38 = vpop.f32.mrf.mxu1  ;;  %v2283_v9 = vmul.f32 %v3950_v30, %v3950_v30  ;;  %v2282_v34 = vmul.f32 %v3958_v22, %v3958_v22 }
 0x104   : > { %2726 = vadd.xlane.f32.xlu1 %v3745_v21  ;;  %v1861_v54 = vsel %vm1860_vm13, %v3898_v10, %v1859_v18  ;;  %v3198_v11 = vpop.eup %3197  ;;  %3211 = vrsqrt.f32 %v4011_v31  ;;  %v1812_v52 = vsub.f32 %v3911_v26, %v1796_v19  ;;  %v1813_v21 = vsub.f32 %v3962_v49, %v1797_v25 }
 0x105   : > { %v1864_v48 = vsel %vm1862_vm14, %v1863_v35, %v1861_v54  ;;  %v1866_v22 = vmul.f32 %v3196_v33, %v3921_v44  ;;  %vm1876_vm1 = vcmp.eq.f32.partialorder %v3927_v1, 0.0  ;;  %v1877_v15 = vand.u32 2147483648, %v3927_v1 }
 0x106   : > { %v4031_v30 = vsub.f32 %v1864_v48, %v2254_v40  ;;  %v3200_v8 = vpop.eup %3199  ;;  %v4036_v59 = vmax.f32 %v1812_v52, 0.0  ;;  %v4038_v63 = vmax.f32 %v1813_v21, 0.0  ;;  %vm1895_vm4 = vcmp.eq.f32.partialorder %v3944_v0, inf }
 0x107   : > { %vm1897_vm5 = vcmp.eq.f32.partialorder %v3944_v0, 0.0  ;;  %v3202_v10 = vpop.eup %3201  ;;  %2705 = vadd.xlane.f32.xlu0 %v3765_v27  ;;  %v2302_v39 = vsel %vm2298_vm2, %v2283_v9, 0.0  ;;  %v1894_v40 = vmul.f32 %v3200_v8, %v3944_v0  ;;  %v1898_v26 = vand.u32 2147483648, %v3944_v0 }
 0x108   : > { %2729 = vadd.xlane.f32.xlu1 %v3762_v7  ;;  %v1868_v49 = vsel %vm1867_vm12, %v3921_v44, %v1866_v22  ;;  %3213 = vrsqrt.f32 %v4036_v59  ;;  %v2299_v51 = vsel %vm2298_vm2, %v2282_v34, 0.0  ;;  %v1873_v7 = vmul.f32 %v3198_v11, %v3927_v1 }
 0x109   : > { %v1871_v17 = vsel %vm1869_vm15, %v1870_v42, %v1868_v49  ;;  %3215 = vrsqrt.f32 %v4038_v63  ;;  %v1896_v27 = vsel %vm1895_vm4, %v3944_v0, %v1894_v40  ;;  %vm1888_vm6 = vcmp.eq.f32.partialorder %v3954_v58, inf }
 0x10a   : > { %v4059_v24 = vsub.f32 %v1871_v17, %v2255_v29  ;;  %v1899_v46 = vsel %vm1897_vm5, %v1898_v26, %v1896_v27  ;;  %vm1902_vm7 = vcmp.eq.f32.partialorder %v3982_v37, inf  ;;  %v1875_v44 = vsel %vm1874_vm0, %v3927_v1, %v1873_v7 }
 0x10b   : > { %v1887_v50 = vmul.f32 %v3202_v10, %v3954_v58  ;;  %vm1881_vm8 = vcmp.eq.f32.partialorder %v3976_v60, inf  ;;  %v3204_v20 = vpop.eup %3203  ;;  %2708 = vadd.xlane.f32.xlu0 %v3781_v43  ;;  %v4368_v28 = vand.u32 2147483647, %v3726_v5  ;;  %v2285_v0 = vmul.f32 %v3991_v4, %v3991_v4 }
 0x10c   : > { %2732 = vadd.xlane.f32.xlu1 %v3768_v2  ;;  %v1905_v35 = vand.u32 2147483648, %v3982_v37  ;;  %v1878_v12 = vsel %vm1876_vm1, %v1877_v15, %v1875_v44  ;;  %v3206_v41 = vpop.eup %3205  ;;  %v1908_v18 = vmul.f32 %v3204_v20, %v3978_v62  ;;  %v1891_v5 = vand.u32 2147483648, %v3954_v58 }
 0x10d   : > { %v2275_v29 = vsub.f32 %v1899_v46, %v4368_v28  ;;  %v4081_v42 = vsub.f32 %v1878_v12, %v3858_v16  ;;  %v1889_v2 = vsel %vm1888_vm6, %v3954_v58, %v1887_v50  ;;  %v1901_v43 = vmul.f32 %v3206_v41, %v3982_v37 }
 0x10e   : > { %vm1909_vm9 = vcmp.eq.f32.partialorder %v3978_v62, inf  ;;  %v1912_v4 = vand.u32 2147483648, %v3978_v62  ;;  %vm1890_vm10 = vcmp.eq.f32.partialorder %v3954_v58, 0.0  ;;  %v3208_v1 = vpop.eup %3207  ;;  %v2284_v33 = vmul.f32 %v3999_v23, %v3999_v23 }
 0x10f   : > { %v1910_v16 = vsel %vm1909_vm9, %v3978_v62, %v1908_v18  ;;  %vm1911_vm11 = vcmp.eq.f32.partialorder %v3978_v62, 0.0  ;;  %v1892_v19 = vsel %vm1890_vm10, %v1891_v5, %v1889_v2  ;;  %2711 = vadd.xlane.f32.xlu0 %v3787_v32  ;;  %v1903_v25 = vsel %vm1902_vm7, %v3982_v37, %v1901_v43  ;;  %v2650_v43 = vld [vmem:[%s3593_s26 + $0x38] sm:$0xff] }
 0x110   : > { %2735 = vadd.xlane.f32.xlu1 %v3784_v56  ;;  %vm1904_vm12 = vcmp.eq.f32.partialorder %v3982_v37, 0.0  ;;  %v1913_v58 = vsel %vm1911_vm11, %v1912_v4, %v1910_v16  ;;  %v4369_v6 = vand.u32 2147483647, %v3704_v36  ;;  %v3210_v23 = vpop.eup %3209  ;;  %vm1916_vm13 = vcmp.eq.f32.partialorder %v4011_v31, inf  ;;  %v2642_v4 = vld [vmem:[%s3587_s22 + $0x78] sm:$0xff] }
 0x111   : > { %v1906_v9 = vsel %vm1904_vm12, %v1905_v35, %v1903_v25  ;;  %v2277_v62 = vsub.f32 %v1913_v58, %v3804_v45  ;;  %v1919_v56 = vand.u32 2147483648, %v4011_v31  ;;  %v3212_v32 = vpop.eup %3211  ;;  %v1922_v54 = vmul.f32 %v3210_v23, %v4007_v3 }
 0x112   : > { %v4103_v38 = vsub.f32 %v1892_v19, %v4369_v6  ;;  %v2276_v34 = vsub.f32 %v1906_v9, %v3772_v47  ;;  %vm1923_vm14 = vcmp.eq.f32.partialorder %v4007_v3, inf  ;;  %v1880_v37 = vmul.f32 %v3208_v1, %v3976_v60  ;;  %v2658_v1 = vld [vmem:[%s3593_s26 + $0x78] sm:$0xff] }
 0x113   : > { %v2291_v36 = vmul.f32 %v2275_v29, %v2275_v29  ;;  %v1915_v11 = vmul.f32 %v3212_v32, %v4011_v31  ;;  %v1926_v52 = vand.u32 2147483648, %v4007_v3  ;;  %v1884_v45 = vand.u32 2147483648, %v3976_v60  ;;  %2300 = vadd.xlane.f32.xlu0 %v2299_v51 }
 0x114   : > { %2303 = vadd.xlane.f32.xlu1 %v2302_v39  ;;  %v1924_v21 = vsel %vm1923_vm14, %v4007_v3, %v1922_v54  ;;  %vm1925_vm15 = vcmp.eq.f32.partialorder %v4007_v3, 0.0  ;;  %v1882_v47 = vsel %vm1881_vm8, %v3976_v60, %v1880_v37  ;;  %vm1883_vm0 = vcmp.eq.f32.partialorder %v3976_v60, 0.0 }
 0x115   : > { %v1917_v48 = vsel %vm1916_vm13, %v4011_v31, %v1915_v11  ;;  %vm1918_vm1 = vcmp.eq.f32.partialorder %v4011_v31, 0.0  ;;  %v1927_v22 = vsel %vm1925_vm15, %v1926_v52, %v1924_v21  ;;  %v1885_v15 = vsel %vm1883_vm0, %v1884_v45, %v1882_v47  ;;  %v3214_v8 = vpop.eup %3213 }
 0x116   : > { %v2305_v10 = vsel %vm2298_vm2, %v2284_v33, 0.0  ;;  %v1920_v39 = vsel %vm1918_vm1, %v1919_v56, %v1917_v48  ;;  %v4370_v3 = vand.u32 2147483647, %v3843_v13  ;;  %v2273_v26 = vsub.f32 %v1885_v15, %v3879_v14  ;;  %v3216_v49 = vpop.eup %3215 }
 0x117   : > { %v2326_v60 = vsel %vm2298_vm2, %v2291_v36, 0.0  ;;  %v2292_v51 = vmul.f32 %v2276_v34, %v2276_v34  ;;  %v4371_v17 = vand.u32 2147483647, %v3819_v57  ;;  %v1929_v31 = vmul.f32 %v3214_v8, %v4036_v59  ;;  %2306 = vadd.xlane.f32.xlu0 %v2305_v10 }
 0x118   : > { %v2279_v40 = vsub.f32 %v1927_v22, %v4370_v3  ;;  %2327 = vadd.xlane.f32.xlu1 %v2326_v60  ;;  %v2308_v27 = vsel %vm2298_vm2, %v2285_v0, 0.0  ;;  %vm1930_vm4 = vcmp.eq.f32.partialorder %v4036_v59, inf  ;;  %v1933_v13 = vand.u32 2147483648, %v4036_v59 }
 0x119   : > { %v2278_v7 = vsub.f32 %v1920_v39, %v4371_v17  ;;  %v1936_v46 = vmul.f32 %v3216_v49, %v4038_v63  ;;  %v1931_v14 = vsel %vm1930_vm4, %v4036_v59, %v1929_v31  ;;  %vm1932_vm5 = vcmp.eq.f32.partialorder %v4036_v59, 0.0 }
 0x11a   : > { %vm1937_vm6 = vcmp.eq.f32.partialorder %v4038_v63, inf  ;;  %v1940_v57 = vand.u32 2147483648, %v4038_v63  ;;  %v2286_v44 = vmul.f32 %v4031_v30, %v4031_v30  ;;  %v1934_v50 = vsel %vm1932_vm5, %v1933_v13, %v1931_v14 }
 0x11b   : > { %v1938_v20 = vsel %vm1937_vm6, %v4038_v63, %v1936_v46  ;;  %vm1939_vm7 = vcmp.eq.f32.partialorder %v4038_v63, 0.0  ;;  %v2329_v28 = vsel %vm2298_vm2, %v2292_v51, 0.0  ;;  %v2293_v29 = vmul.f32 %v2277_v62, %v2277_v62  ;;  %2309 = vadd.xlane.f32.xlu0 %v2308_v27 }
 0x11c   : > { %v2280_v0 = vsub.f32 %v1934_v50, %v3877_v61  ;;  %v1941_v35 = vsel %vm1939_vm7, %v1940_v57, %v1938_v20  ;;  %2330 = vadd.xlane.f32.xlu1 %v2329_v28  ;;  %v2311_v30 = vsel %vm2298_vm2, %v2286_v44, 0.0  ;;  %v2287_v63 = vmul.f32 %v4059_v24, %v4059_v24 }
 0x11d   : > { %v2281_v59 = vsub.f32 %v1941_v35, %v3915_v55  ;;  %v2332_v12 = vsel %vm2298_vm2, %v2293_v29, 0.0  ;;  %v2294_v41 = vmul.f32 %v2278_v7, %v2278_v7  ;;  %v2288_v2 = vmul.f32 %v4081_v42, %v4081_v42  ;;  %v2634_v55 = vld [vmem:[%s3587_s22 + $0x38] sm:$0xff]  ;;  %s3221_s22 = sshll.u32 %s3282_s17, 4  ;;  %s3222_s22 = int_to_ptr.vmem [resolvable:$false] %s3221_s22 }
 0x11e   : > { %v2314_v61 = vsel %vm2298_vm2, %v2287_v63, 0.0  ;;  %v2295_v5 = vmul.f32 %v2279_v40, %v2279_v40  ;;  %v2290_v16 = vmul.f32 %v4103_v38, %v4103_v38  ;;  %v2296_v19 = vmul.f32 %v2280_v0, %v2280_v0  ;;  %s3223_s23 = scalar_lea.vmem %s3222_s22, 32  ;;  %p3224_p1 = scmp.lt.s32.totalorder %s2878_s11, %s3222_s22 }
 0x11f   : > { %2312 = vadd.xlane.f32.xlu0 %v2311_v30  ;;  %v2335_v18 = vsel %vm2298_vm2, %v2294_v41, 0.0  ;;  %v2317_v33 = vsel %vm2298_vm2, %v2288_v2, 0.0  ;;  %v2666_v25 = vsub.f32 %v2634_v55, %v2650_v43  ;;  %v2674_v58 = vsub.f32 %v2642_v4, %v2658_v1  ;;  %p3225_p2 = scmp.lt.s32.totalorder %s3223_s23, %s3217_s16 }
 0x120   : > { %2333 = vadd.xlane.f32.xlu1 %v2332_v12  ;;  %v2338_v24 = vsel %vm2298_vm2, %v2295_v5, 0.0  ;;  %v2323_v42 = vsel %vm2298_vm2, %v2290_v16, 0.0  ;;  %v2341_v6 = vsel %vm2298_vm2, %v2296_v19, 0.0  ;;  %v2289_v23 = vmul.f32 %v2273_v26, %v2273_v26 }
 0x121   : > { %v2297_v9 = vmul.f32 %v2281_v59, %v2281_v59  ;;  %v2682_v62 = vmul.f32 %v2666_v25, %v2666_v25  ;;  %v2690_v56 = vmul.f32 %v2674_v58, %v2674_v58  ;;  %vm1648_vm8 = vcmask 1042434   ;;  %p3226_p3 = por %p3225_p2, %p3224_p1 }
 0x122   : > { %v2320_v32 = vsel %vm2298_vm2, %v2289_v23, 0.0  ;;  %vm1650_vm9 = vcmask 1043459   ;;  %vm1652_vm10 = vcmask 1044484   ;;  %vm1654_vm11 = vcmask 1045509  }
 0x123   : > { %2315 = vadd.xlane.f32.xlu0 %v2314_v61  ;;  %v2344_v34 = vsel %vm2298_vm2, %v2297_v9, 0.0  ;;  %v2713_v38 = vsel %vm2691_vm3, %v2682_v62, 0.0  ;;  %v2737_v54 = vsel %vm2691_vm3, %v2690_v56, 0.0  ;;  %vm1647_vm3 = vcmask 1041409   ;;  %v330_v56 = vld [vmem:[%s298_s8] sm:$0xff]  ;;  %p3227_p4 = pnand %p3226_p3, %p3220_p0 }
 0x124   : > { %2336 = vadd.xlane.f32.xlu1 %v2335_v18  ;;  %vm1656_vm12 = vcmask 1046534   ;;  %vm1658_vm13 = vcmask 1047559   ;;  %vm2862_vm14 = vcmask 122880  }
 0x127   : > { %2318 = vadd.xlane.f32.xlu0 %v2317_v33 }
 0x128   : > { %2339 = vadd.xlane.f32.xlu1 %v2338_v24 }
 0x12b   : > { %2324 = vadd.xlane.f32.xlu0 %v2323_v42 }
 0x12c   : > { %2342 = vadd.xlane.f32.xlu1 %v2341_v6 }
 0x12f   : > { %2321 = vadd.xlane.f32.xlu0 %v2320_v32  ;;  %v331_v32 = vld [vmem:[%s298_s8 + $0x8] sm:$0xff] }
 0x130   : > { %2345 = vadd.xlane.f32.xlu1 %v2344_v34 }
 0x133   : > { %2714 = vadd.xlane.f32.xlu0 %v2713_v38 }
 0x134   : > { %2738 = vadd.xlane.f32.xlu1 %v2737_v54 }
 0x15c   : > { %v2453_v37 = vpop.xlane.xlu0 %2452  ;;  %v2456_v11 = vpop.xlane.xlu1 %2455 }
 0x15d   : > { %v2500_v8 = vmul.f32 0.125, %v2456_v11  ;;  %v2499_v10 = vmul.f32 0.125, %v2453_v37 }
 0x15f   : > { %v2538_v7 = vrot.slane %v2500_v8, %v3609_v53  ;;  %v2534_v13 = vrot.slane %v2499_v10, %v3609_v53 }
 0x160   : > { %v2477_v36 = vpop.xlane.xlu0 %2476 }
 0x161   : > { %v2507_v3 = vmul.f32 0.125, %v2477_v36  ;;  %v2595_v41 = vsel %vm1647_vm3, %v2538_v7, %v2534_v13 }
 0x163   : > { %v2566_v44 = vrot.slane %v2507_v3, %v3609_v53 }
 0x164   : > { %v2480_v52 = vpop.xlane.xlu0 %2479 }
 0x165   : > { %v2508_v39 = vmul.f32 0.125, %v2480_v52 }
 0x167   : > { %v2570_v46 = vrot.slane %v2508_v39, %v3609_v53 }
 0x168   : > { %v2483_v45 = vpop.xlane.xlu1 %2482  ;;  %v2459_v21 = vpop.xlane.xlu0 %2458 }
 0x169   : > { %v2509_v40 = vmul.f32 0.125, %v2483_v45  ;;  %v2501_v26 = vmul.f32 0.125, %v2459_v21  ;;  %v2602_v61 = vsel %vm1647_vm3, %v2570_v46, %v2566_v44 }
 0x16b   : > { %v2574_v50 = vrot.slane %v2509_v40, %v3609_v53  ;;  %v2542_v20 = vrot.slane %v2501_v26, %v3609_v53 }
 0x16c   : > { %v2486_v47 = vpop.xlane.xlu1 %2485  ;;  %v2462_v48 = vpop.xlane.xlu0 %2461 }
 0x16d   : > { %v2510_v51 = vmul.f32 0.125, %v2486_v47  ;;  %v2502_v17 = vmul.f32 0.125, %v2462_v48  ;;  %v2603_v5 = vsel %vm1648_vm8, %v2574_v50, %v2602_v61  ;;  %v2596_v55 = vsel %vm1648_vm8, %v2542_v20, %v2595_v41 }
 0x16f   : > { %v2578_v0 = vrot.slane %v2510_v51, %v3609_v53  ;;  %v2546_v35 = vrot.slane %v2502_v17, %v3609_v53 }
 0x170   : > { %v2465_v15 = vpop.xlane.xlu0 %2464 }
 0x171   : > { %v2489_v22 = vpop.xlane.xlu1 %2488  ;;  %v2503_v27 = vmul.f32 0.125, %v2465_v15  ;;  %v2604_v24 = vsel %vm1650_vm9, %v2578_v0, %v2603_v5  ;;  %v2597_v16 = vsel %vm1650_vm9, %v2546_v35, %v2596_v55 }
 0x172   : > { %v2511_v31 = vmul.f32 0.125, %v2489_v22 }
 0x173   : > { %v2550_v63 = vrot.slane %v2503_v27, %v3609_v53 }
 0x174   : > { %v2468_v60 = vpop.xlane.xlu0 %2467  ;;  %v2582_v12 = vrot.slane %v2511_v31, %v3609_v53 }
 0x175   : > { %v2492_v49 = vpop.xlane.xlu1 %2491  ;;  %v2504_v57 = vmul.f32 0.125, %v2468_v60  ;;  %v2598_v42 = vsel %vm1652_vm10, %v2550_v63, %v2597_v16 }
 0x176   : > { %v2512_v14 = vmul.f32 0.125, %v2492_v49  ;;  %v2605_v58 = vsel %vm1652_vm10, %v2582_v12, %v2604_v24 }
 0x177   : > { %v2554_v2 = vrot.slane %v2504_v57, %v3609_v53 }
 0x178   : > { %v2471_v29 = vpop.xlane.xlu0 %2470  ;;  %v2586_v18 = vrot.slane %v2512_v14, %v3609_v53 }
 0x179   : > { %v2495_v28 = vpop.xlane.xlu1 %2494  ;;  %v2505_v30 = vmul.f32 0.125, %v2471_v29  ;;  %v2599_v23 = vsel %vm1654_vm11, %v2554_v2, %v2598_v42 }
 0x17a   : > { %v2513_v59 = vmul.f32 0.125, %v2495_v28  ;;  %v2606_v6 = vsel %vm1654_vm11, %v2586_v18, %v2605_v58 }
 0x17b   : > { %v2558_v4 = vrot.slane %v2505_v30, %v3609_v53 }
 0x17c   : > { %v2590_v43 = vrot.slane %v2513_v59, %v3609_v53  ;;  %v2474_v33 = vpop.xlane.xlu0 %2473 }
 0x17d   : > { %v2498_v1 = vpop.xlane.xlu1 %2497  ;;  %v2506_v25 = vmul.f32 0.125, %v2474_v33  ;;  %v2600_v54 = vsel %vm1656_vm12, %v2558_v4, %v2599_v23 }
 0x17e   : > { %v2514_v19 = vmul.f32 0.125, %v2498_v1  ;;  %v2607_v37 = vsel %vm1656_vm12, %v2590_v43, %v2606_v6 }
 0x17f   : > { %v2562_v62 = vrot.slane %v2506_v25, %v3609_v53 }
 0x180   : > { %v2594_v9 = vrot.slane %v2514_v19, %v3609_v53  ;;  %v2694_v38 = vpop.xlane.xlu0 %2693 }
 0x181   : > { %v2697_v34 = vpop.xlane.xlu1 %2696  ;;  %v2601_v36 = vsel %vm1658_vm13, %v2562_v62, %v2600_v54  ;;  %v2759_v4 = vrot.slane %v2694_v38, %v3609_v53 }
 0x182   : > { %v2608_v11 = vsel %vm1658_vm13, %v2594_v9, %v2607_v37  ;;  %v2611_v52 = vsub.f32 %v330_v56, %v2601_v36  ;;  %v2763_v43 = vrot.slane %v2697_v34, %v3609_v53 }
 0x183   : > { %v2612_v45 = vsub.f32 %v331_v32, %v2608_v11 }
 0x184   : > { %v2718_v47 = vpop.xlane.xlu0 %2717  ;;  %v2613_v48 = vmul.f32 %v2611_v52, %v2611_v52  ;;  %v2820_v58 = vsel %vm1647_vm3, %v2763_v43, %v2759_v4 }
 0x185   : > { %v2721_v21 = vpop.xlane.xlu1 %2720  ;;  %v2614_v22 = vmul.f32 %v2612_v45, %v2612_v45  ;;  %v2791_v8 = vrot.slane %v2718_v47, %v3609_v53 }
 0x186   : > { %v2795_v15 = vrot.slane %v2721_v21, %v3609_v53  ;;  %v2615_v10 = vsel %vm2298_vm2, %v2613_v48, 0.0 }
 0x187   : > { %v2618_v39 = vsel %vm2298_vm2, %v2614_v22, 0.0  ;;  %2616 = vadd.xlane.f32.xlu0 %v2615_v10 }
 0x188   : > { %2619 = vadd.xlane.f32.xlu1 %v2618_v39  ;;  %v2700_v40 = vpop.xlane.xlu0 %2699  ;;  %v2827_v49 = vsel %vm1647_vm3, %v2795_v15, %v2791_v8 }
 0x189   : > { %v2724_v3 = vpop.xlane.xlu1 %2723  ;;  %v2767_v1 = vrot.slane %v2700_v40, %v3609_v53 }
 0x18a   : > { %v2799_v26 = vrot.slane %v2724_v3, %v3609_v53 }
 0x18b   : > { %v2821_v6 = vsel %vm1648_vm8, %v2767_v1, %v2820_v58  ;;  %v4372_v58 = vld [vmem:[#allocation6_spill] sm:$0xff] }
 0x18c   : > { %v2828_v60 = vsel %vm1648_vm8, %v2799_v26, %v2827_v49  ;;  %v4212_v17 = vpop.xlane.xlu0 %2702 }
 0x18d   : > { %v2727_v51 = vpop.xlane.xlu1 %2726  ;;  %v2771_v54 = vrot.slane %v4212_v17, %v3609_v53 }
 0x18e   : > { %v2803_v7 = vrot.slane %v2727_v51, %v3609_v53 }
 0x190   : > { %v2829_v31 = vsel %vm1650_vm9, %v2803_v7, %v2828_v60  ;;  %v4216_v13 = vpop.xlane.xlu0 %2705 }
 0x191   : > { %v2730_v27 = vpop.xlane.xlu1 %2729  ;;  %v2775_v52 = vrot.slane %v4216_v13, %v3609_v53 }
 0x192   : > { %v2807_v46 = vrot.slane %v2730_v27, %v3609_v53 }
 0x194   : > { %v2830_v14 = vsel %vm1652_vm10, %v2807_v46, %v2829_v31  ;;  %v4220_v44 = vpop.xlane.xlu0 %2708  ;;  %v2822_v31 = vsel %vm1650_vm9, %v2771_v54, %v2821_v6 }
 0x195   : > { %v2733_v57 = vpop.xlane.xlu1 %2732  ;;  %v2779_v48 = vrot.slane %v4220_v44, %v3609_v53 }
 0x196   : > { %v2811_v50 = vrot.slane %v2733_v57, %v3609_v53 }
 0x198   : > { %v2831_v20 = vsel %vm1654_vm11, %v2811_v50, %v2830_v14  ;;  %v4224_v29 = vpop.xlane.xlu0 %2711  ;;  %v2823_v14 = vsel %vm1652_vm10, %v2775_v52, %v2822_v31 }
 0x199   : > { %v2736_v28 = vpop.xlane.xlu1 %2735  ;;  %v2783_v60 = vrot.slane %v4224_v29, %v3609_v53 }
 0x19a   : > { %v2815_v0 = vrot.slane %v2736_v28, %v3609_v53  ;;  %v2824_v28 = vsel %vm1654_vm11, %v2779_v48, %v2823_v14 }
 0x19c   : > { %v4228_v35 = vsel %vm1656_vm12, %v2815_v0, %v2831_v20  ;;  %v2301_v30 = vpop.xlane.xlu0 %2300 }
 0x19d   : > { %v2304_v59 = vpop.xlane.xlu1 %2303  ;;  %v2366_v19 = vrot.slane %v2301_v30, %v3609_v53 }
 0x19e   : > { %v2370_v16 = vrot.slane %v2304_v59, %v3609_v53 }
 0x1a0   : > { %v2307_v63 = vpop.xlane.xlu0 %2306  ;;  %v2427_v56 = vsel %vm1647_vm3, %v2370_v16, %v2366_v19 }
 0x1a1   : > { %v2328_v12 = vpop.xlane.xlu1 %2327  ;;  %v2374_v25 = vrot.slane %v2307_v63, %v3609_v53 }
 0x1a2   : > { %v2402_v32 = vrot.slane %v2328_v12, %v3609_v53  ;;  %v2825_v12 = vsel %vm1656_vm12, %v2783_v60, %v2824_v28 }
 0x1a3   : > { %v2428_v37 = vsel %vm1648_vm8, %v2374_v25, %v2427_v56 }
 0x1a4   : > { %v2310_v41 = vpop.xlane.xlu0 %2309 }
 0x1a5   : > { %v2331_v61 = vpop.xlane.xlu1 %2330  ;;  %v2378_v42 = vrot.slane %v2310_v41, %v3609_v53 }
 0x1a6   : > { %v2406_v36 = vrot.slane %v2331_v61, %v3609_v53 }
 0x1a7   : > { %v2429_v45 = vsel %vm1650_vm9, %v2378_v42, %v2428_v37 }
 0x1a8   : > { %v2313_v18 = vpop.xlane.xlu0 %2312 }
 0x1a9   : > { %v2334_v2 = vpop.xlane.xlu1 %2333  ;;  %v2382_v23 = vrot.slane %v2313_v18, %v3609_v53 }
 0x1aa   : > { %v2410_v21 = vrot.slane %v2334_v2, %v3609_v53 }
 0x1ab   : > { %v2430_v22 = vsel %vm1652_vm10, %v2382_v23, %v2429_v45 }
 0x1ac   : > { %v2316_v5 = vpop.xlane.xlu0 %2315 }
 0x1ad   : > { %v2337_v55 = vpop.xlane.xlu1 %2336  ;;  %v2386_v34 = vrot.slane %v2316_v5, %v3609_v53 }
 0x1ae   : > { %v2414_v15 = vrot.slane %v2337_v55, %v3609_v53 }
 0x1af   : > { %v2431_v3 = vsel %vm1654_vm11, %v2386_v34, %v2430_v22  ;;  %v4373_v34 = vld [vmem:[#allocation5_spill] sm:$0xff] }
 0x1b0   : > { %v2319_v33 = vpop.xlane.xlu0 %2318 }
 0x1b1   : > { %v2340_v24 = vpop.xlane.xlu1 %2339  ;;  %v2390_v11 = vrot.slane %v2319_v33, %v3609_v53 }
 0x1b2   : > { %v2418_v40 = vrot.slane %v2340_v24, %v3609_v53 }
 0x1b3   : > { %v2432_v17 = vsel %vm1656_vm12, %v2390_v11, %v2431_v3 }
 0x1b4   : > { %v2325_v9 = vpop.xlane.xlu0 %2324 }
 0x1b5   : > { %v2343_v62 = vpop.xlane.xlu1 %2342  ;;  %v2398_v38 = vrot.slane %v2325_v9, %v3609_v53 }
 0x1b6   : > { %v2422_v51 = vrot.slane %v2343_v62, %v3609_v53 }
 0x1b7   : > { %v2434_v47 = vsel %vm1647_vm3, %v2402_v32, %v2398_v38 }
 0x1b8   : > { %v2435_v8 = vsel %vm1648_vm8, %v2406_v36, %v2434_v47  ;;  %v2322_v10 = vpop.xlane.xlu0 %2321 }
 0x1b9   : > { %v2346_v39 = vpop.xlane.xlu1 %2345  ;;  %v2436_v26 = vsel %vm1650_vm9, %v2410_v21, %v2435_v8  ;;  %v2394_v49 = vrot.slane %v2322_v10, %v3609_v53 }
 0x1ba   : > { %v2437_v7 = vsel %vm1652_vm10, %v2414_v15, %v2436_v26  ;;  %v2426_v27 = vrot.slane %v2346_v39, %v3609_v53 }
 0x1bb   : > { %v2433_v13 = vsel %vm1658_vm13, %v2394_v49, %v2432_v17  ;;  %v2438_v46 = vsel %vm1654_vm11, %v2418_v40, %v2437_v7 }
 0x1bc   : > { %v2715_v57 = vpop.xlane.xlu0 %2714  ;;  %v2443_v50 = vsel %vm2298_vm2, %v2433_v13, 0.0  ;;  %v2439_v20 = vsel %vm1656_vm12, %v2422_v51, %v2438_v46 }
 0x1bd   : > { %v2739_v44 = vpop.xlane.xlu1 %2738  ;;  %v2787_v29 = vrot.slane %v2715_v57, %v3609_v53  ;;  %2444 = vadd.xlane.f32.xlu0 %v2443_v50  ;;  %v2440_v59 = vsel %vm1658_vm13, %v2426_v27, %v2439_v20 }
 0x1be   : > { %v2819_v0 = vrot.slane %v2739_v44, %v3609_v53  ;;  %v2446_v30 = vsel %vm2298_vm2, %v2440_v59, 0.0 }
 0x1bf   : > { %2447 = vadd.xlane.f32.xlu1 %v2446_v30  ;;  %v2826_v63 = vsel %vm1658_vm13, %v2787_v29, %v2825_v12 }
 0x1c0   : > { %v2833_v41 = vsel %vm1658_vm13, %v2819_v0, %v4228_v35  ;;  %v2836_v61 = vsel %vm2298_vm2, %v2826_v63, 0.0  ;;  %v2854_v35 = vadd.s32 4294967288, %v4372_v58 }
 0x1c1   : > { %2837 = vadd.xlane.f32.xlu0 %v2836_v61  ;;  %v2839_v18 = vsel %vm2298_vm2, %v2833_v41, 0.0  ;;  %vm2859_vm2 = vcmask 130112  }
 0x1c2   : > { %v2857_v38 = vsub.s32 %v2854_v35, %v4373_v34 }
 0x1c3   : > { %2840 = vadd.xlane.f32.xlu1 %v2839_v18 }
 0x210   : > { %v2617_v2 = vpop.xlane.xlu0 %2616 }
 0x211   : > { %v2620_v5 = vpop.xlane.xlu1 %2619  ;;  %v2621_v43 = vmul.f32 0.125, %v2617_v2 }
 0x212   : > { %v2622_v1 = vmul.f32 0.125, %v2620_v5 }
 0x213   : > { %v2623_v16 = vmul.f32 0.5, %v2621_v43 }
 0x214   : > { %v2624_v6 = vmul.f32 0.5, %v2622_v1 }
 0x246   : > { %v2445_v55 = vpop.xlane.xlu0 %2444 }
 0x247   : > { %v2449_v33 = vmul.f32 0.015625, %v2445_v55 }
 0x248   : > { %v2448_v4 = vpop.xlane.xlu1 %2447 }
 0x249   : > { %v2450_v19 = vmul.f32 0.015625, %v2448_v4  ;;  %v2625_v23 = vadd.f32 %v2623_v16, %v2449_v33 }
 0x24a   : > { %v2838_v24 = vpop.xlane.xlu0 %2837 }
 0x24b   : > { %v2842_v25 = vmul.f32 0.03125, %v2838_v24  ;;  %v2626_v56 = vadd.f32 %v2624_v6, %v2450_v19 }
 0x24c   : > { %v2841_v42 = vpop.xlane.xlu1 %2840 }
 0x24d   : > { %v2844_v9 = vmul.f32 0.3, %v2842_v25  ;;  %v2843_v62 = vmul.f32 0.03125, %v2841_v42 }
 0x24f   : > { %v2846_v32 = vadd.f32 %v2844_v9, %v2625_v23  ;;  %v2845_v54 = vmul.f32 0.3, %v2843_v62 }
 0x251   : > { %v2847_v37 = vadd.f32 %v2845_v54, %v2626_v56  ;;  %v2853_v36 = vrot.slane %v2846_v32, %v3609_v53 }
 0x253   : > { %v2858_v11 = vrot.slane %v2847_v37, %v2857_v38 }
 0x255   : > { %v2860_v52 = vsel %vm2859_vm2, %v2858_v11, %v2853_v36 }
 0x256   : > { %2863 = vst.msk [vmem:[%s281_s10] sm:$0x1] %vm2862_vm14, %v2860_v52 }
 0x257   : > { %3230 = shalt.err (!%p3227_p4)
}
 0x258   : > { %s3231_s30 = scalar_lea.hbm %s4294_s14, 16  ;;  %s3235_s6 = scalar_lea.hbm %s4334_s5, 32 }
 0x259   : > { %p3232_p7 = scmp.ne.s32.totalorder %s4294_s14, %s3231_s30  ;;  %p3236_p10 = scmp.lt.s32.totalorder %s4294_s14, %s4334_s5 }
 0x25a   : > { %p3237_p11 = scmp.lt.s32.totalorder %s3235_s6, %s3231_s30 }
 0x25b   : > { %p3233_p8 = pnand %p3232_p7, %p3351_p5 }
 0x25c   : > { %p3238_p12 = por %p3237_p11, %p3236_p10 }
 0x25d   : > { %p3234_p9 = pneg %p3233_p8 }
 0x25f   : > { %p3239_p13 = pnand %p3238_p12, %p3234_p9 }
 0x261   : > { %3242 = shalt.err (!%p3239_p13)
}
 0x262   : > { %3141 = dma.vmem_to_hbm [thread:$0]  (%p3351_p5), %s2878_s11, 16, %s4294_s14, %s2865_s15  }
 0x263 PF: > { %p3147_p0 = scmp.ge.s32.totalorder %s3277_s21, 2  ;;  %s2889_s9 = sand.u32 1, %s3265_s18  }
 0x264   : > { %s2890_s10 = scalar_lea.sflag [#allocation3], %s2889_s9 }
 0x265   : > { %p3144_p1 = pnand %p3147_p0, %p3355_p6 }
 0x267   : > { %p3145_p2 = pneg %p3144_p1 }
 0x269   : > { %3260 = dma.done.wait (%p3145_p2), %s2890_s10, 16  }
 0x26a   : > { %3262 = vsyncadd (%p3145_p2), %s2890_s10, 4294967280  ;;  %p15_p3 = scmp.ge.s32.totalorder %s3338_s24, 4   ;;  %s4374_s18 = smov %s3269_s19 }
 0x26b   : > { %s4375_s19 = smov %s3273_s20  ;;  %s4376_s20 = smov %s3349_s27 }
 0x26c   : > { %s4377_s21 = smov %s3338_s24  ;;  %17 = sbr.rel (!%p15_p3) target bundleno = 3 (0x3), region = 87 }
 0x271   :  { %2894 = vsyncpa [#allocation3], 1 }
 0x272   :  { %2896 = vsyncpa [#allocation3 + $0x1], 1 }

</bundles_post_ra>
